<compile_context>
chip_gen: v7x
topology: tpu7x:2x2x1
jax: 0.10.0
libtpu: 0.0.40
codegen_flags: <defaults>
</compile_context>

<pallas_src>
import functools
import math

import jax
import jax.numpy as jnp
import numpy as np
from jax.experimental import pallas as pl
from jax.experimental.pallas import tpu as pltpu

_EPS = 1e-5


# ---------------------------------------------------------------------------
# Kernels
# ---------------------------------------------------------------------------
def _biasfree_ln_kernel(x_ref, w_ref, o_ref):
    """Plain path: one tensor row per block row. x_ref (T, C); w_ref (1, C) f32."""
    x = x_ref[...].astype(jnp.float32)
    w = w_ref[...]                                        # already f32
    mu = jnp.mean(x, axis=-1, keepdims=True)              # (T, 1)
    d = x - mu
    var = jnp.mean(d * d, axis=-1, keepdims=True)         # biased variance (two-pass)
    inv = jax.lax.rsqrt(var + _EPS)                       # EUP
    o_ref[...] = (x * inv * w).astype(o_ref.dtype)        # NOTE: mean not subtracted


def _biasfree_ln_packed_kernel(x_ref, w_ref, seg_ref, segt_ref, o_ref, *, inv_c):
    """Lane-packed path: g consecutive tensor rows per block row.

    x_ref:    (T, G) with G = g*C, a multiple of 128 (fully lane dense).
    w_ref:    (1, G) f32 weight tiled g times.
    seg_ref:  (G, g) constant 0/1 segment matrix (column k selects sub-row k).
    segt_ref: (g, G) its transpose (broadcasts per-sub-row stats back to lanes).
    """
    x = x_ref[...].astype(jnp.float32)
    w = w_ref[...]
    seg = seg_ref[...]
    segt = segt_ref[...]
    hi = jax.lax.Precision.HIGHEST  # exact f32 segment sums; MXU is idle anyway
    # Per-sub-row mean via segment matmul on the MXU.
    mu = jnp.dot(x, seg, preferred_element_type=jnp.float32, precision=hi) * inv_c
    mu_b = jnp.dot(mu, segt, preferred_element_type=jnp.float32, precision=hi)
    d = x - mu_b
    var = jnp.dot(d * d, seg, preferred_element_type=jnp.float32, precision=hi) * inv_c
    inv = jax.lax.rsqrt(var + _EPS)                                         # (T, g)
    inv_b = jnp.dot(inv, segt, preferred_element_type=jnp.float32, precision=hi)
    o_ref[...] = (x * inv_b * w).astype(o_ref.dtype)      # NOTE: mean not subtracted


# ---------------------------------------------------------------------------
# Tile sizing: budget by lane-padded VMEM footprint, capped by an HBM tile target.
# ---------------------------------------------------------------------------
def _choose_tile_rows(rows, lane_width, in_itemsize, out_itemsize,
                      vmem_budget_bytes=36 * 1024 * 1024,
                      target_hbm_tile_bytes=4 * 1024 * 1024):
    """Row-tile size: fits a 36 MiB VMEM working set and ~4 MiB of x per block."""
    padded_lanes = ((lane_width + 127) // 128) * 128      # VMEM pads the lane dim
    # VMEM bytes per block row: 2 double-buffered input blocks + 2 output blocks
    # + ~3 f32 temporaries (x cast, d/d*d, pre-cast output) inside the kernel.
    vmem_per_row = padded_lanes * (2 * in_itemsize + 2 * out_itemsize + 3 * 4)
    hbm_per_row = max(lane_width * in_itemsize, 1)
    tr = min(vmem_budget_bytes // max(vmem_per_row, 1),
             target_hbm_tile_bytes // hbm_per_row)
    tr = max(8, (tr // 8) * 8)                            # sublane alignment
    rows_up = ((rows + 7) // 8) * 8                       # never exceed what's needed
    return max(8, min(tr, rows_up))


_COMPILER_PARAMS = pltpu.CompilerParams(
    dimension_semantics=("parallel",),            # shards rows across TCs on v7x
    vmem_limit_bytes=48 * 1024 * 1024,            # safe on v5e/v6e (128 MiB) and v7x (64 MiB)
)


# ---------------------------------------------------------------------------
# Wrapper
# ---------------------------------------------------------------------------
def biasfree_layernorm(x, weight, *, tile_rows=None):
    """x: (..., C) array. weight: (C,) array. Returns same shape/dtype as x."""
    orig_shape = x.shape
    C = orig_shape[-1]
    assert weight.shape == (C,)

    x2d = x.reshape(-1, C)                        # (rows, C), no padding copy
    rows = x2d.shape[0]
    in_itemsize = jnp.dtype(x.dtype).itemsize
    out_itemsize = in_itemsize

    # Lane-packing factor: smallest g with (g*C) % 128 == 0. Only worth it when C
    # is not already lane dense, g is small, and the packing reshape stays free.
    g = 1
    if C % 128 != 0:
        g_cand = 128 // math.gcd(C, 128)
        if g_cand <= 16 and rows % g_cand == 0:
            g = g_cand
        # TODO(synk): relaxed packing (g*C >= 128 but not a multiple) for odd C /
        # row counts not divisible by g; those fall back to the masked plain path.

    if g > 1:
        # -------- lane-dense packed path --------
        G = g * C
        prows = rows // g
        xp = x2d.reshape(prows, G)                # free contiguous reshape

        w_rep = jnp.tile(weight.astype(jnp.float32).reshape(1, C), (1, g))  # (1, G)
        lane_owner = np.arange(G) // C
        seg_np = (lane_owner[:, None] == np.arange(g)[None, :]).astype(np.float32)
        seg = jnp.asarray(seg_np)                 # (G, g)
        segt = jnp.asarray(np.ascontiguousarray(seg_np.T))   # (g, G)

        if tile_rows is None:
            tr = _choose_tile_rows(prows, G, in_itemsize, out_itemsize)
        else:
            tr = max(8, (int(tile_rows) // 8) * 8)

        grid = (pl.cdiv(prows, tr),)              # partial last block; OOB writes masked
        kernel = functools.partial(_biasfree_ln_packed_kernel, inv_c=1.0 / C)

        out = pl.pallas_call(
            kernel,
            out_shape=jax.ShapeDtypeStruct((prows, G), x.dtype),
            grid_spec=pltpu.PrefetchScalarGridSpec(
                num_scalar_prefetch=0,
                grid=grid,
                in_specs=[
                    pl.BlockSpec((tr, G), lambda i: (i, 0)),
                    pl.BlockSpec((1, G), lambda i: (0, 0)),
                    pl.BlockSpec((G, g), lambda i: (0, 0)),
                    pl.BlockSpec((g, G), lambda i: (0, 0)),
                ],
                out_specs=pl.BlockSpec((tr, G), lambda i: (i, 0)),
            ),
            compiler_params=_COMPILER_PARAMS,
        )(xp, w_rep, seg, segt)
        return out.reshape(orig_shape)

    # -------- plain path (C multiple of 128, or packing not applicable) --------
    if tile_rows is None:
        tr = _choose_tile_rows(rows, C, in_itemsize, out_itemsize)
    else:
        tr = max(8, (int(tile_rows) // 8) * 8)

    w2d = weight.reshape(1, C).astype(jnp.float32)        # cast hoisted out of kernel
    grid = (pl.cdiv(rows, tr),)                           # partial last block masked

    out = pl.pallas_call(
        _biasfree_ln_kernel,
        out_shape=jax.ShapeDtypeStruct((rows, C), x.dtype),
        grid_spec=pltpu.PrefetchScalarGridSpec(
            num_scalar_prefetch=0,
            grid=grid,
            in_specs=[
                pl.BlockSpec((tr, C), lambda i: (i, 0)),
                pl.BlockSpec((1, C), lambda i: (0, 0)),
            ],
            out_specs=pl.BlockSpec((tr, C), lambda i: (i, 0)),
        ),
        compiler_params=_COMPILER_PARAMS,
    )(x2d, w2d)
    return out.reshape(orig_shape)


# ---------------------------------------------------------------------------
# Self-test
# ---------------------------------------------------------------------------
if __name__ == "__main__":
    key = jax.random.PRNGKey(0)
    k1, k2, k3, k4 = jax.random.split(key, 4)

    def ref_ln(x, w):
        xf = x.astype(jnp.float32)
        mu = jnp.mean(xf, axis=-1, keepdims=True)
        sigma = jnp.mean((xf - mu) ** 2, axis=-1, keepdims=True)   # unbiased=False
        return (xf / jnp.sqrt(sigma + _EPS) * w).astype(x.dtype)

    # Case 1: Restormer-like (B, H*W, C) with C=48 -> lane-packed path, g=8, G=384.
    B, HW, C = 2, 64, 48
    x1 = jax.random.normal(k1, (B, HW, C), dtype=jnp.float32)
    w1 = jnp.linspace(0.5, 1.5, C, dtype=jnp.float32)
    o1 = jax.block_until_ready(biasfree_layernorm(x1, w1))
    assert jnp.allclose(o1, ref_ln(x1, w1), atol=1e-4, rtol=1e-5), "mismatch (case 1)"

    # Case 2: tiny (batch=2, seq=8, hidden=32) -> packed path g=4, single partial block.
    x2 = jax.random.normal(k2, (2, 8, 32), dtype=jnp.float32)
    w2 = jnp.ones((32,), dtype=jnp.float32)       # matches nn.Parameter(torch.ones(C))
    o2 = jax.block_until_ready(biasfree_layernorm(x2, w2))
    assert jnp.allclose(o2, ref_ln(x2, w2), atol=1e-4, rtol=1e-5), "mismatch (case 2)"

    # Case 3: rows not divisible by g -> falls back to masked plain path.
    x3 = jax.random.normal(k3, (3, 5, 48), dtype=jnp.float32)
    w3 = jnp.linspace(0.8, 1.2, 48, dtype=jnp.float32)
    o3 = jax.block_until_ready(biasfree_layernorm(x3, w3))
    assert jnp.allclose(o3, ref_ln(x3, w3), atol=1e-4, rtol=1e-5), "mismatch (case 3)"

    # Case 4: C multiple of 128 -> lane-dense plain path.
    x4 = jax.random.normal(k4, (2, 8, 128), dtype=jnp.float32)
    w4 = jnp.linspace(0.9, 1.1, 128, dtype=jnp.float32)
    o4 = jax.block_until_ready(biasfree_layernorm(x4, w4))
    assert jnp.allclose(o4, ref_ln(x4, w4), atol=1e-4, rtol=1e-5), "mismatch (case 4)"

    print("KERNEL_OK")
</pallas_src>

<mosaic_0001>
module attributes {stable_mosaic.version = 11 : i64} {
  func.func @_biasfree_ln_packed_kernel(%arg0: i32, %arg1: memref<16x384xf32, #tpu.memory_space<vmem>>, %arg2: memref<1x384xf32, #tpu.memory_space<vmem>>, %arg3: memref<384x8xf32, #tpu.memory_space<vmem>>, %arg4: memref<8x384xf32, #tpu.memory_space<vmem>>, %arg5: memref<16x384xf32, #tpu.memory_space<vmem>>) attributes {dimension_semantics = [#tpu.dimension_semantics<parallel>], iteration_bounds = array<i64: 1>, scalar_prefetch = 0 : i64, scratch_operands = 0 : i64, tpu.core_type = #tpu.core_type<tc>, window_params = [{transform_indices = @transform_0, window_bounds = array<i64: 16, 384>}, {pipeline_mode = #tpu.pipeline_mode<synchronous>, transform_indices = @transform_1, window_bounds = array<i64: 1, 384>}, {pipeline_mode = #tpu.pipeline_mode<synchronous>, transform_indices = @transform_2, window_bounds = array<i64: 384, 8>}, {pipeline_mode = #tpu.pipeline_mode<synchronous>, transform_indices = @transform_3, window_bounds = array<i64: 8, 384>}, {transform_indices = @transform_4, window_bounds = array<i64: 16, 384>}]} {
    %c0 = arith.constant 0 : index
    %c0_0 = arith.constant 0 : index
    %0 = vector.load %arg1[%c0, %c0_0] : memref<16x384xf32, #tpu.memory_space<vmem>>, vector<16x384xf32>
    %c0_1 = arith.constant 0 : index
    %c0_2 = arith.constant 0 : index
    %1 = vector.load %arg2[%c0_1, %c0_2] : memref<1x384xf32, #tpu.memory_space<vmem>>, vector<1x384xf32>
    %c0_3 = arith.constant 0 : index
    %c0_4 = arith.constant 0 : index
    %2 = vector.load %arg3[%c0_3, %c0_4] : memref<384x8xf32, #tpu.memory_space<vmem>>, vector<384x8xf32>
    %c0_5 = arith.constant 0 : index
    %c0_6 = arith.constant 0 : index
    %3 = vector.load %arg4[%c0_5, %c0_6] : memref<8x384xf32, #tpu.memory_space<vmem>>, vector<8x384xf32>
    %cst = arith.constant dense<0.000000e+00> : vector<16x8xf32>
    %4 = tpu.matmul %0, %2, %cst {dimension_numbers = #tpu.dot_dimension_numbers<[1], [0], [0], [1], [0, 0, 1, 1], [], []>, precision = #tpu.contract_precision<fp32>} : vector<16x384xf32>, vector<384x8xf32>, vector<16x8xf32> -> vector<16x8xf32>
    %cst_7 = arith.constant 0.020833334 : f32
    %5 = vector.broadcast %cst_7 : f32 to vector<16x8xf32>
    %6 = arith.mulf %4, %5 : vector<16x8xf32>
    %cst_8 = arith.constant dense<0.000000e+00> : vector<16x384xf32>
    %7 = tpu.matmul %6, %3, %cst_8 {dimension_numbers = #tpu.dot_dimension_numbers<[1], [0], [0], [1], [0, 0, 1, 1], [], []>, precision = #tpu.contract_precision<fp32>} : vector<16x8xf32>, vector<8x384xf32>, vector<16x384xf32> -> vector<16x384xf32>
    %8 = arith.subf %0, %7 : vector<16x384xf32>
    %9 = arith.mulf %8, %8 : vector<16x384xf32>
    %cst_9 = arith.constant dense<0.000000e+00> : vector<16x8xf32>
    %10 = tpu.matmul %9, %2, %cst_9 {dimension_numbers = #tpu.dot_dimension_numbers<[1], [0], [0], [1], [0, 0, 1, 1], [], []>, precision = #tpu.contract_precision<fp32>} : vector<16x384xf32>, vector<384x8xf32>, vector<16x8xf32> -> vector<16x8xf32>
    %cst_10 = arith.constant 0.020833334 : f32
    %11 = vector.broadcast %cst_10 : f32 to vector<16x8xf32>
    %12 = arith.mulf %10, %11 : vector<16x8xf32>
    %cst_11 = arith.constant 9.99999974E-6 : f32
    %13 = vector.broadcast %cst_11 : f32 to vector<16x8xf32>
    %14 = arith.addf %12, %13 : vector<16x8xf32>
    %15 = math.rsqrt %14 : vector<16x8xf32>
    %cst_12 = arith.constant dense<0.000000e+00> : vector<16x384xf32>
    %16 = tpu.matmul %15, %3, %cst_12 {dimension_numbers = #tpu.dot_dimension_numbers<[1], [0], [0], [1], [0, 0, 1, 1], [], []>, precision = #tpu.contract_precision<fp32>} : vector<16x8xf32>, vector<8x384xf32>, vector<16x384xf32> -> vector<16x384xf32>
    %17 = arith.mulf %0, %16 : vector<16x384xf32>
    %18 = vector.broadcast %1 : vector<1x384xf32> to vector<16x384xf32>
    %19 = arith.mulf %17, %18 : vector<16x384xf32>
    %c0_13 = arith.constant 0 : index
    %c0_14 = arith.constant 0 : index
    %20 = vector.load %arg5[%c0_13, %c0_14] : memref<16x384xf32, #tpu.memory_space<vmem>>, vector<16x384xf32>
    tpu.vector_store %arg5[%c0_13, %c0_14], %19 {strides = array<i32>} : memref<16x384xf32, #tpu.memory_space<vmem>>, vector<16x384xf32>,
    return
  }
  func.func @transform_0(%arg0: i32) -> (i32, i32) {
    %c0_i32 = arith.constant 0 : i32
    %c0_i32_0 = arith.constant 0 : i32
    return %arg0, %c0_i32 : i32, i32
  }
  func.func @transform_1(%arg0: i32) -> (i32, i32) {
    %c0_i32 = arith.constant 0 : i32
    %c0_i32_0 = arith.constant 0 : i32
    %c0_i32_1 = arith.constant 0 : i32
    return %c0_i32, %c0_i32_0 : i32, i32
  }
  func.func @transform_2(%arg0: i32) -> (i32, i32) {
    %c0_i32 = arith.constant 0 : i32
    %c0_i32_0 = arith.constant 0 : i32
    %c0_i32_1 = arith.constant 0 : i32
    return %c0_i32, %c0_i32_0 : i32, i32
  }
  func.func @transform_3(%arg0: i32) -> (i32, i32) {
    %c0_i32 = arith.constant 0 : i32
    %c0_i32_0 = arith.constant 0 : i32
    %c0_i32_1 = arith.constant 0 : i32
    return %c0_i32, %c0_i32_0 : i32, i32
  }
  func.func @transform_4(%arg0: i32) -> (i32, i32) {
    %c0_i32 = arith.constant 0 : i32
    %c0_i32_0 = arith.constant 0 : i32
    return %arg0, %c0_i32 : i32, i32
  }
}

</mosaic_0001>

<bundles_post_ra>
// kernel: tpu_custom_call.1
= control target key start
LH: loop header
LB: loop body
LE: loop exit
PB: predicated region body
PF: predicated region fallthrough
CT: control target
= control target key end

     0   :  { %s8889_s0 = inlined_call_operand.vmem [shape: f32[16,384], index: 0, kind: input, shape index: {}]   ;;  %s8890_s1 = inlined_call_operand.vmem [shape: f32[1,384], index: 1, kind: input, shape index: {}]   ;;  %s8891_s2 = inlined_call_operand.vmem [shape: f32[384,8], index: 2, kind: input, shape index: {}]   ;;  %s8892_s3 = inlined_call_operand.vmem [shape: f32[8,384], index: 3, kind: input, shape index: {}]   ;;  %s8893_s4 = inlined_call_operand.hbm [shape: f32[16,384], index: 4, kind: output, shape index: {}]  }
   0x1   :  { %v41_v0 = vld [vmem:[%s8891_s2 + $0x80] sm:$0xff]  ;;  %v42_v1 = vld [vmem:[%s8891_s2 + $0x88] sm:$0xff]  ;;  %v43_v7 = vld [vmem:[%s8891_s2 + $0x90] sm:$0xff] }
   0x2   :  { %v25_v2 = vld [vmem:[%s8891_s2] sm:$0xff]  ;;  %v125_v3 = vand.u32 4294901760, %v41_v0  ;;  %v128_v4 = vand.u32 4294901760, %v42_v1  ;;  %v26_v5 = vld [vmem:[%s8891_s2 + $0x8] sm:$0xff]  ;;  %v44_v8 = vld [vmem:[%s8891_s2 + $0x98] sm:$0xff]  ;;  %v131_v10 = vand.u32 4294901760, %v43_v7 }
   0x3   :  { %v77_v6 = vand.u32 4294901760, %v25_v2  ;;  %v80_v9 = vand.u32 4294901760, %v26_v5  ;;  %v134_v11 = vand.u32 4294901760, %v44_v8  ;;  %v27_v12 = vld [vmem:[%s8891_s2 + $0x10] sm:$0xff]  ;;  %v28_v13 = vld [vmem:[%s8891_s2 + $0x18] sm:$0xff]  ;;  %v45_v22 = vld [vmem:[%s8891_s2 + $0xa0] sm:$0xff] }
   0x4   :  { %v7502_v14 = vpack.c.bf16 %v128_v4, %v125_v3  ;;  %v7504_v15 = vsub.f32 %v41_v0, %v125_v3  ;;  %v7506_v16 = vsub.f32 %v42_v1, %v128_v4  ;;  %v83_v21 = vand.u32 4294901760, %v27_v12  ;;  %v46_v23 = vld [vmem:[%s8891_s2 + $0xa8] sm:$0xff]  ;;  %v29_v28 = vld [vmem:[%s8891_s2 + $0x20] sm:$0xff]  ;;  %v47_v30 = vld [vmem:[%s8891_s2 + $0xb0] sm:$0xff] }
   0x5   :  { %v7508_v17 = vsub.f32 %v25_v2, %v77_v6  ;;  %v7510_v18 = vpack.c.bf16 %v80_v9, %v77_v6  ;;  %v7512_v19 = vsub.f32 %v26_v5, %v80_v9  ;;  %v7514_v20 = vpack.c.bf16 %v134_v11, %v131_v10  ;;  %v30_v29 = vld [vmem:[%s8891_s2 + $0x28] sm:$0xff]  ;;  %v48_v39 = vld [vmem:[%s8891_s2 + $0xb8] sm:$0xff]  ;;  %v31_v44 = vld [vmem:[%s8891_s2 + $0x30] sm:$0xff] }
   0x6   :  { %6558 = vmatprep.subr.bf16.mxu1 %v7502_v14  ;;  %v7525_v24 = vpack.c.bf16 %v7506_v16, %v7504_v15  ;;  %v86_v26 = vand.u32 4294901760, %v28_v13  ;;  %v7528_v27 = vsub.f32 %v43_v7, %v131_v10  ;;  %v7545_v33 = vsub.f32 %v44_v8, %v134_v11  ;;  %v32_v45 = vld [vmem:[%s8891_s2 + $0x38] sm:$0xff]  ;;  %v49_v50 = vld [vmem:[%s8891_s2 + $0xc0] sm:$0xff]  ;;  %v50_v55 = vld [vmem:[%s8891_s2 + $0xc8] sm:$0xff] }
   0x7   :  { %6560 = vmatpush3.bf16.msra.mxu1 %v7510_v18  ;;  %v7543_v32 = vpack.c.bf16 %v7512_v19, %v7508_v17  ;;  %v7547_v34 = vsub.f32 %v27_v12, %v83_v21  ;;  %v137_v37 = vand.u32 4294901760, %v45_v22  ;;  %v140_v38 = vand.u32 4294901760, %v46_v23  ;;  %v33_v60 = vld [vmem:[%s8891_s2 + $0x40] sm:$0xff]  ;;  %v34_v61 = vld [vmem:[%s8891_s2 + $0x48] sm:$0xff]  ;;  %v51_v2 = vld [vmem:[%s8891_s2 + $0xd0] sm:$0xff] }
   0x8   :  { %9019 = vst [vmem:[#allocation5_spill] sm:$0xff] %v7525_v24  ;;  %6622 = vmatprep.subr.bf16.mxu0 %v7525_v24  ;;  %6562 = vmatprep.subr.bf16.mxu1 %v7514_v20  ;;  %v7551_v35 = vpack.c.bf16 %v86_v26, %v83_v21  ;;  %v7553_v36 = vsub.f32 %v28_v13, %v86_v26  ;;  %v89_v41 = vand.u32 4294901760, %v29_v28  ;;  %v92_v42 = vand.u32 4294901760, %v30_v29  ;;  %v52_v7 = vld [vmem:[%s8891_s2 + $0xd8] sm:$0xff]  ;;  %v35_v12 = vld [vmem:[%s8891_s2 + $0x50] sm:$0xff] }
   0x9   :  { %9020 = vst [vmem:[#allocation6_spill] sm:$0xff] %v7543_v32  ;;  %6624 = vmatpush3.bf16.msra.mxu0 %v7543_v32  ;;  %v7561_v40 = vpack.c.bf16 %v7545_v33, %v7528_v27  ;;  %v143_v43 = vand.u32 4294901760, %v47_v30  ;;  %v7573_v47 = vpack.c.bf16 %v140_v38, %v137_v37  ;;  %v7575_v48 = vsub.f32 %v45_v22, %v137_v37  ;;  %v36_v13 = vld [vmem:[%s8891_s2 + $0x58] sm:$0xff] }
   0xa   :  { %v7571_v46 = vpack.c.bf16 %v7553_v36, %v7547_v34  ;;  %v7577_v49 = vsub.f32 %v46_v23, %v140_v38  ;;  %v7584_v51 = vpack.c.bf16 %v92_v42, %v89_v41  ;;  %v7586_v52 = vsub.f32 %v29_v28, %v89_v41  ;;  %v53_v28 = vld [vmem:[%s8891_s2 + $0xe0] sm:$0xff] }
   0xb   :  { %9021 = vst [vmem:[#allocation7_spill] sm:$0xff] %v7561_v40  ;;  %6564 = vmatpush3.bf16.msra.mxu1 %v7551_v35  ;;  %6626 = vmatprep.subr.bf16.mxu0 %v7561_v40  ;;  %v7588_v53 = vsub.f32 %v30_v29, %v92_v42  ;;  %v146_v54 = vand.u32 4294901760, %v48_v39  ;;  %v95_v57 = vand.u32 4294901760, %v31_v44  ;;  %v98_v58 = vand.u32 4294901760, %v32_v45 }
   0xc   :  { %9022 = vst [vmem:[#allocation8_spill] sm:$0xff] %v7571_v46  ;;  %6566 = vmatprep.subr.bf16.mxu1 %v7573_v47  ;;  %v7596_v56 = vpack.c.bf16 %v7577_v49, %v7575_v48  ;;  %v7598_v59 = vsub.f32 %v47_v30, %v143_v43  ;;  %v149_v1 = vand.u32 4294901760, %v49_v50  ;;  %v152_v6 = vand.u32 4294901760, %v50_v55 }
   0xd   :  { %6628 = vmatpush3.bf16.msra.mxu0 %v7571_v46  ;;  %v7609_v62 = vpack.c.bf16 %v7588_v53, %v7586_v52  ;;  %v7611_v63 = vpack.c.bf16 %v146_v54, %v143_v43  ;;  %v7613_v0 = vsub.f32 %v48_v39, %v146_v54  ;;  %v7619_v3 = vpack.c.bf16 %v98_v58, %v95_v57  ;;  %v54_v39 = vld [vmem:[%s8891_s2 + $0xe8] sm:$0xff] }
   0xe   :  { %9023 = vst [vmem:[#allocation9_spill] sm:$0xff] %v7596_v56  ;;  %6630 = vmatprep.subr.bf16.mxu0 %v7596_v56  ;;  %v7621_v4 = vsub.f32 %v31_v44, %v95_v57  ;;  %v7623_v5 = vsub.f32 %v32_v45, %v98_v58  ;;  %v101_v9 = vand.u32 4294901760, %v33_v60  ;;  %v104_v10 = vand.u32 4294901760, %v34_v61  ;;  %v37_v45 = vld [vmem:[%s8891_s2 + $0x60] sm:$0xff] }
   0xf   :  { %9024 = vst [vmem:[#allocation10_spill] sm:$0xff] %v7609_v62  ;;  %9025 = vst [vmem:[#allocation11_spill] sm:$0xff] %v7619_v3  ;;  %6568 = vmatpush3.bf16.msra.mxu1 %v7584_v51  ;;  %v7631_v8 = vpack.c.bf16 %v7613_v0, %v7598_v59  ;;  %v7633_v11 = vsub.f32 %v49_v50, %v149_v1  ;;  %v7646_v22 = vpack.c.bf16 %v152_v6, %v149_v1  ;;  %v38_v50 = vld [vmem:[%s8891_s2 + $0x68] sm:$0xff] }
  0x10   :  { %6570 = vmatprep.subr.bf16.mxu1 %v7611_v63  ;;  %v7644_v21 = vpack.c.bf16 %v7623_v5, %v7621_v4  ;;  %v7648_v23 = vsub.f32 %v50_v55, %v152_v6  ;;  %v155_v26 = vand.u32 4294901760, %v51_v2  ;;  %v7654_v29 = vpack.c.bf16 %v104_v10, %v101_v9 }
  0x11   :  { %9026 = vst [vmem:[#allocation12_spill] sm:$0xff] %v7631_v8  ;;  %9028 = vst [vmem:[#allocation14_spill] sm:$0xff] %v7646_v22  ;;  %6632 = vmatpush3.bf16.msra.mxu0 %v7609_v62  ;;  %v7656_v30 = vsub.f32 %v33_v60, %v101_v9  ;;  %v7658_v37 = vsub.f32 %v34_v61, %v104_v10  ;;  %v158_v38 = vand.u32 4294901760, %v52_v7  ;;  %v107_v42 = vand.u32 4294901760, %v35_v12  ;;  %v55_v60 = vld [vmem:[%s8891_s2 + $0xf0] sm:$0xff] }
  0x12   :  { %9027 = vst [vmem:[#allocation13_spill] sm:$0xff] %v7644_v21  ;;  %9029 = vst [vmem:[#allocation15_spill] sm:$0xff] %v7654_v29  ;;  %6634 = vmatprep.subr.bf16.mxu0 %v7631_v8  ;;  %v7666_v41 = vpack.c.bf16 %v7648_v23, %v7633_v11  ;;  %v110_v43 = vand.u32 4294901760, %v36_v13  ;;  %v7668_v44 = vsub.f32 %v51_v2, %v155_v26  ;;  %v161_v58 = vand.u32 4294901760, %v53_v28 }
  0x13   :  { %6572 = vmatpush3.bf16.msra.mxu1 %v7619_v3  ;;  %v7679_v54 = vpack.c.bf16 %v7658_v37, %v7656_v30  ;;  %v7681_v55 = vpack.c.bf16 %v158_v38, %v155_v26  ;;  %v7683_v57 = vsub.f32 %v52_v7, %v158_v38 }
  0x14   :  { %9030 = vst [vmem:[#allocation16_spill] sm:$0xff] %v7666_v41 }
  0x15   :  { %9031 = vst [vmem:[#allocation17_spill] sm:$0xff] %v7679_v54  ;;  %9032 = vst [vmem:[#allocation18_spill] sm:$0xff] %v7681_v55 }
  0x16   :  { %9 = vsyncpa [#allocation3], 0  ;;  %6574 = vmatprep.subr.bf16.mxu1 %v7646_v22  ;;  %v7689_v61 = vpack.c.bf16 %v110_v43, %v107_v42  ;;  %v7691_v1 = vsub.f32 %v35_v12, %v107_v42  ;;  %v7693_v2 = vsub.f32 %v36_v13, %v110_v43  ;;  %v164_v6 = vand.u32 4294901760, %v54_v39  ;;  %v56_v7 = vld [vmem:[%s8891_s2 + $0xf8] sm:$0xff]  ;;  %6636 = vmatpush3.bf16.msra.mxu0 %v7644_v21  ;;  %v39_v12 = vld [vmem:[%s8891_s2 + $0x70] sm:$0xff] }
  0x17   :  { %v7701_v9 = vpack.c.bf16 %v7683_v57, %v7668_v44  ;;  %v113_v10 = vand.u32 4294901760, %v37_v45  ;;  %v116_v26 = vand.u32 4294901760, %v38_v50  ;;  %v7703_v38 = vsub.f32 %v53_v28, %v161_v58  ;;  %v40_v13 = vld [vmem:[%s8891_s2 + $0x78] sm:$0xff]  ;;  %6638 = vmatprep.subr.bf16.mxu0 %v7666_v41  ;;  %v19_v25 = vld [vmem:[%s8889_s0 + $0x8] sm:$0xff]  ;;  %6576 = vmatpush3.bf16.msra.mxu1 %v7654_v29  ;;  %v18_v46 = vld [vmem:[%s8889_s0] sm:$0xff] }
  0x18   :  { %9033 = vst [vmem:[#allocation19_spill] sm:$0xff] %v7689_v61  ;;  %v7714_v42 = vpack.c.bf16 %v7693_v2, %v7691_v1  ;;  %v7716_v43 = vpack.c.bf16 %v164_v6, %v161_v58  ;;  %v7718_v31 = vsub.f32 %v54_v39, %v164_v6  ;;  %v167_v28 = vand.u32 4294901760, %v55_v60  ;;  %6578 = vmatprep.subr.bf16.mxu1 %v7681_v55 }
  0x19   :  { %9034 = vst [vmem:[#allocation20_spill] sm:$0xff] %v7701_v9  ;;  %v7724_v21 = vpack.c.bf16 %v116_v26, %v113_v10  ;;  %v7726_v8 = vsub.f32 %v37_v45, %v113_v10  ;;  %v7728_v41 = vsub.f32 %v38_v50, %v116_v26  ;;  %v170_v62 = vand.u32 4294901760, %v56_v7 }
  0x1a   :  { %9035 = vst [vmem:[#allocation21_spill] sm:$0xff] %v7714_v42  ;;  %9036 = vst [vmem:[#allocation22_spill] sm:$0xff] %v7716_v43  ;;  %v7733_v39 = vpack.c.bf16 %v7718_v31, %v7703_v38  ;;  %v119_v58 = vand.u32 4294901760, %v39_v12  ;;  %v122_v6 = vand.u32 4294901760, %v40_v13  ;;  %v7735_v56 = vsub.f32 %v55_v60, %v167_v28  ;;  %6640 = vmatpush3.bf16.msra.mxu0 %v7679_v54 }
  0x1b   :  { %v7743_v45 = vpack.c.bf16 %v7728_v41, %v7726_v8  ;;  %v7745_v50 = vpack.c.bf16 %v170_v62, %v167_v28  ;;  %v7747_v10 = vsub.f32 %v56_v7, %v170_v62  ;;  %v7749_v26 = vand.u32 4294901760, %v19_v25  ;;  %6642 = vmatprep.subr.bf16.mxu0 %v7701_v9  ;;  %6580 = vmatpush3.bf16.msra.mxu1 %v7689_v61 }
  0x1c   :  { %9037 = vst [vmem:[#allocation23_spill] sm:$0xff] %v7733_v39  ;;  %v7752_v60 = vpack.c.bf16 %v122_v6, %v119_v58  ;;  %v7754_v40 = vsub.f32 %v39_v12, %v119_v58  ;;  %v7756_v32 = vsub.f32 %v40_v13, %v122_v6  ;;  %v318_v54 = vand.u32 4294901760, %v7504_v15  ;;  %6582 = vmatprep.subr.bf16.mxu1 %v7716_v43 }
  0x1d   :  { %9038 = vst [vmem:[#allocation24_spill] sm:$0xff] %v7743_v45  ;;  %v7762_v28 = vpack.c.bf16 %v7747_v10, %v7735_v56  ;;  %v7765_v62 = vsub.f32 %v19_v25, %v7749_v26  ;;  %v325_v7 = vand.u32 4294901760, %v7506_v16  ;;  %v7768_v9 = vand.u32 4294901760, %v18_v46 }
  0x1e   :  { %v7773_v12 = vpack.c.bf16 %v7756_v32, %v7754_v40  ;;  %v319_v13 = vsub.f32 %v7504_v15, %v318_v54  ;;  %v9041_v58 = vand.u32 4294901760, %v7508_v17  ;;  %v9042_v24 = vand.u32 4294901760, %v7512_v19  ;;  %6644 = vmatpush3.bf16.msra.mxu0 %v7714_v42 }
  0x1f   :  { %9039 = vst [vmem:[#allocation25_spill] sm:$0xff] %v7762_v28  ;;  %v8918_v61 = vand.u32 4294901760, %v7765_v62  ;;  %v326_v43 = vsub.f32 %v7506_v16, %v325_v7  ;;  %v7786_v55 = vsub.f32 %v18_v46, %v7768_v9  ;;  %572 = vmatprep.mubr.f32.mxu0 %v7765_v62  ;;  %v7789_v15 = vpack.c.bf16 %v325_v7, %v318_v54 }
  0x20   :  { %9040 = vst [vmem:[#allocation26_spill] sm:$0xff] %v7773_v12  ;;  %v207_v6 = vsub.f32 %v7508_v17, %v9041_v58  ;;  %v214_v25 = vsub.f32 %v7512_v19, %v9042_v24  ;;  %6646 = vmatprep.subr.bf16.mxu0 %v7733_v39  ;;  %v320_v58 = vand.u32 4294901760, %v319_v13  ;;  %v9044_v24 = vand.u32 4294901760, %v7508_v17  ;;  %6584 = vmatpush3.bf16.msra.mxu1 %v7724_v21 }
  0x21   :  { %9043 = vst [vmem:[#allocation27_spill] sm:$0xff] %v7789_v15  ;;  %v9045_v42 = vand.u32 4294901760, %v7512_v19  ;;  %v175_v16 = vsub.f32 %v7765_v62, %v8918_v61  ;;  %v327_v46 = vand.u32 4294901760, %v326_v43  ;;  %v8920_v54 = vand.u32 4294901760, %v7786_v55  ;;  %6586 = vmatprep.subr.bf16.mxu1 %v7745_v50 }
  0x22   :  { %v208_v29 = vand.u32 4294901760, %v207_v6  ;;  %v215_v22 = vand.u32 4294901760, %v214_v25  ;;  %v332_v7 = vand.u32 4294901760, %v7528_v27  ;;  %v339_v17 = vand.u32 4294901760, %v7545_v33  ;;  %6648 = vmatpush3.bf16.msra.mxu0 %v7743_v45 }
  0x23   :  { %v7796_v3 = vpack.c.bf16 %v9045_v42, %v9044_v24  ;;  %v220_v19 = vand.u32 4294901760, %v7547_v34  ;;  %v227_v42 = vand.u32 4294901760, %v7553_v36  ;;  %v176_v6 = vand.u32 4294901760, %v175_v16  ;;  %6650 = vmatprep.subr.bf16.mxu0 %v7762_v28 }
  0x24   :  { %v7805_v13 = vpack.c.bf16 %v215_v22, %v208_v29  ;;  %v7811_v25 = vpack.c.bf16 %v327_v46, %v320_v58  ;;  %v181_v43 = vsub.f32 %v7786_v55, %v8920_v54  ;;  %v333_v24 = vsub.f32 %v7528_v27, %v332_v7  ;;  %6588 = vmatpush3.bf16.msra.mxu1 %v7752_v60 }
  0x25   :  { %9046 = vst [vmem:[#allocation28_spill] sm:$0xff] %v7796_v3  ;;  %v340_v22 = vsub.f32 %v7545_v33, %v339_v17  ;;  %v221_v29 = vsub.f32 %v7547_v34, %v220_v19  ;;  %v228_v61 = vsub.f32 %v7553_v36, %v227_v42  ;;  %v7821_v39 = vpack.c.bf16 %v339_v17, %v332_v7 }
  0x26   :  { %9047 = vst [vmem:[#allocation29_spill] sm:$0xff] %v7805_v13  ;;  %9048 = vst [vmem:[#allocation30_spill] sm:$0xff] %v7811_v25  ;;  %177 = vmatprep.mubr.f32.mxu1 %v176_v6  ;;  %v182_v58 = vand.u32 4294901760, %v181_v43  ;;  %v334_v16 = vand.u32 4294901760, %v333_v24  ;;  %v7824_v46 = vpack.c.bf16 %v227_v42, %v220_v19  ;;  %v346_v54 = vand.u32 4294901760, %v7575_v48  ;;  %6590 = vmatprep.subr.bf16.mxu1 %v7811_v25 }
  0x27   :  { %9049 = vst [vmem:[#allocation31_spill] sm:$0xff] %v7821_v39  ;;  %v341_v27 = vand.u32 4294901760, %v340_v22  ;;  %v222_v28 = vand.u32 4294901760, %v221_v29  ;;  %v229_v33 = vand.u32 4294901760, %v228_v61  ;;  %v353_v34 = vand.u32 4294901760, %v7577_v49  ;;  %6652 = vmatpush3.bf16.msra.mxu0 %v7773_v12 }
  0x28   :  { %9050 = vst [vmem:[#allocation32_spill] sm:$0xff] %v7824_v46  ;;  %v347_v36 = vsub.f32 %v7575_v48, %v346_v54  ;;  %v234_v7 = vand.u32 4294901760, %v7586_v52  ;;  %v241_v17 = vand.u32 4294901760, %v7588_v53  ;;  %v360_v19 = vand.u32 4294901760, %v7598_v59  ;;  %183 = vmatmul.mubr.f32.vlgmr.msra.gmra.mrb[0].mxu1 %v182_v58  ;;  %6686 = vmatprep.subr.bf16.mxu0 %v7789_v15 }
  0x29   :  { %v7835_v42 = vpack.c.bf16 %v341_v27, %v334_v16  ;;  %v7837_v6 = vpack.c.bf16 %v229_v33, %v222_v28  ;;  %v354_v61 = vsub.f32 %v7577_v49, %v353_v34  ;;  %v367_v43 = vand.u32 4294901760, %v7613_v0  ;;  %6592 = vmatpush3.bf16.msra.mxu1 %v7805_v13 }
  0x2a   :  { %v348_v48 = vand.u32 4294901760, %v347_v36  ;;  %v235_v24 = vsub.f32 %v7586_v52, %v234_v7  ;;  %v242_v22 = vsub.f32 %v7588_v53, %v241_v17  ;;  %v7844_v29 = vpack.c.bf16 %v353_v34, %v346_v54  ;;  %575 = vmatmul.mubr.f32.vlgmr.msra.gmra.mrb[0].mxu0 %v7786_v55 }
  0x2b   :  { %9051 = vst [vmem:[#allocation33_spill] sm:$0xff] %v7835_v42  ;;  %9052 = vst [vmem:[#allocation34_spill] sm:$0xff] %v7837_v6  ;;  %6594 = vmatprep.subr.bf16.mxu1 %v7835_v42  ;;  %v355_v58 = vand.u32 4294901760, %v354_v61  ;;  %v7848_v28 = vpack.c.bf16 %v241_v17, %v234_v7  ;;  %v361_v49 = vsub.f32 %v7598_v59, %v360_v19  ;;  %6688 = vmatpush3.bf16.msra.mxu0 %v7796_v3  ;;  %vm1680_vm0 = vcmask 64512  }
  0x2c   :  { %9053 = vst [vmem:[#allocation35_spill] sm:$0xff] %v7844_v29  ;;  %v368_v16 = vsub.f32 %v7613_v0, %v367_v43  ;;  %v236_v27 = vand.u32 4294901760, %v235_v24  ;;  %v243_v33 = vand.u32 4294901760, %v242_v22  ;;  %v248_v52 = vand.u32 4294901760, %v7621_v4  ;;  %6690 = vmatprep.subr.bf16.mxu0 %v7821_v39 }
  0x2d   :  { %9054 = vst [vmem:[#allocation36_spill] sm:$0xff] %v7848_v28  ;;  %v255_v53 = vand.u32 4294901760, %v7623_v5  ;;  %v7856_v54 = vpack.c.bf16 %v355_v58, %v348_v48  ;;  %v362_v34 = vand.u32 4294901760, %v361_v49  ;;  %v7858_v7 = vpack.c.bf16 %v367_v43, %v360_v19  ;;  %6596 = vmatpush3.bf16.msra.mxu1 %v7837_v6 }
  0x2e   :  { %v369_v36 = vand.u32 4294901760, %v368_v16  ;;  %v7861_v59 = vpack.c.bf16 %v243_v33, %v236_v27  ;;  %v249_v0 = vsub.f32 %v7621_v4, %v248_v52  ;;  %v374_v48 = vand.u32 4294901760, %v7633_v11 }
  0x2f   :  { %9055 = vst [vmem:[#allocation37_spill] sm:$0xff] %v7856_v54  ;;  %9056 = vst [vmem:[#allocation38_spill] sm:$0xff] %v7858_v7  ;;  %v256_v17 = vsub.f32 %v7623_v5, %v255_v53  ;;  %v7865_v61 = vpack.c.bf16 %v255_v53, %v248_v52  ;;  %6598 = vmatprep.subr.bf16.mxu1 %v7856_v54  ;;  %v381_v22 = vand.u32 4294901760, %v7648_v23  ;;  %v262_v19 = vand.u32 4294901760, %v7656_v30  ;;  %v67_v54 = vld [vmem:[%s8891_s2 + $0x150] sm:$0xff] }
  0x30   :  { %9057 = vst [vmem:[#allocation39_spill] sm:$0xff] %v7861_v59  ;;  %v7868_v24 = vpack.c.bf16 %v369_v36, %v362_v34  ;;  %6692 = vmatpush3.bf16.msra.mxu0 %v7824_v46  ;;  %v250_v43 = vand.u32 4294901760, %v249_v0  ;;  %v269_v4 = vand.u32 4294901760, %v7658_v37  ;;  %v388_v5 = vand.u32 4294901760, %v7668_v44 }
  0x31   :  { %9058 = vst [vmem:[#allocation40_spill] sm:$0xff] %v7865_v61  ;;  %v257_v58 = vand.u32 4294901760, %v256_v17  ;;  %6694 = vmatprep.subr.bf16.mxu0 %v7844_v29  ;;  %v375_v49 = vsub.f32 %v7633_v11, %v374_v48  ;;  %v382_v16 = vsub.f32 %v7648_v23, %v381_v22  ;;  %v263_v27 = vsub.f32 %v7656_v30, %v262_v19  ;;  %v9095_v29 = vld [vmem:[#allocation11_spill] sm:$0xff] }
  0x32   :  { %9059 = vst [vmem:[#allocation41_spill] sm:$0xff] %v7868_v24  ;;  %v7880_v33 = vpack.c.bf16 %v381_v22, %v374_v48  ;;  %6600 = vmatpush3.bf16.msra.mxu1 %v7861_v59  ;;  %v270_v53 = vsub.f32 %v7658_v37, %v269_v4  ;;  %v7886_v34 = vpack.c.bf16 %v269_v4, %v262_v19  ;;  %v395_v23 = vand.u32 4294901760, %v7683_v57  ;;  %v22_v4 = vld [vmem:[%s8889_s0 + $0x20] sm:$0xff] }
  0x33   :  { %v7883_v52 = vpack.c.bf16 %v257_v58, %v250_v43  ;;  %v389_v36 = vsub.f32 %v7668_v44, %v388_v5  ;;  %6602 = vmatprep.subr.bf16.mxu1 %v7868_v24  ;;  %v376_v0 = vand.u32 4294901760, %v375_v49  ;;  %v383_v11 = vand.u32 4294901760, %v382_v16 }
  0x34   :  { %9060 = vst [vmem:[#allocation42_spill] sm:$0xff] %v7880_v33  ;;  %9062 = vst [vmem:[#allocation44_spill] sm:$0xff] %v7886_v34  ;;  %v264_v17 = vand.u32 4294901760, %v263_v27  ;;  %6696 = vmatpush3.bf16.msra.mxu0 %v7848_v28  ;;  %v271_v30 = vand.u32 4294901760, %v270_v53  ;;  %v276_v22 = vand.u32 4294901760, %v7691_v1  ;;  %v283_v43 = vand.u32 4294901760, %v7693_v2 }
  0x35   :  { %9061 = vst [vmem:[#allocation43_spill] sm:$0xff] %v7883_v52  ;;  %v390_v48 = vand.u32 4294901760, %v389_v36  ;;  %6698 = vmatprep.subr.bf16.mxu0 %v7858_v7  ;;  %v7895_v37 = vpack.c.bf16 %v383_v11, %v376_v0  ;;  %v396_v44 = vsub.f32 %v7683_v57, %v395_v23  ;;  %v7898_v19 = vpack.c.bf16 %v395_v23, %v388_v5 }
  0x36   :  { %v402_v58 = vand.u32 4294901760, %v7703_v38  ;;  %6604 = vmatpush3.bf16.msra.mxu1 %v7883_v52  ;;  %v7905_v49 = vpack.c.bf16 %v271_v30, %v264_v17  ;;  %v277_v16 = vsub.f32 %v7691_v1, %v276_v22  ;;  %v284_v27 = vsub.f32 %v7693_v2, %v283_v43  ;;  %v21_v2 = vld [vmem:[%s8889_s0 + $0x18] sm:$0xff] }
  0x37   :  { %9063 = vst [vmem:[#allocation45_spill] sm:$0xff] %v7895_v37  ;;  %9064 = vst [vmem:[#allocation46_spill] sm:$0xff] %v7898_v19  ;;  %v7909_v53 = vpack.c.bf16 %v283_v43, %v276_v22  ;;  %6606 = vmatprep.subr.bf16.mxu1 %v7895_v37  ;;  %v397_v57 = vand.u32 4294901760, %v396_v44  ;;  %v409_v36 = vand.u32 4294901760, %v7718_v31  ;;  %v290_v0 = vand.u32 4294901760, %v7726_v8 }
  0x38   :  { %9065 = vst [vmem:[#allocation47_spill] sm:$0xff] %v7905_v49  ;;  %v403_v5 = vsub.f32 %v7703_v38, %v402_v58  ;;  %6700 = vmatpush3.bf16.msra.mxu0 %v7865_v61  ;;  %v278_v11 = vand.u32 4294901760, %v277_v16  ;;  %v285_v17 = vand.u32 4294901760, %v284_v27  ;;  %v297_v23 = vand.u32 4294901760, %v7728_v41 }
  0x39   :  { %9066 = vst [vmem:[#allocation48_spill] sm:$0xff] %v7909_v53  ;;  %v7917_v1 = vand.u32 4294901760, %v22_v4  ;;  %6702 = vmatprep.subr.bf16.mxu0 %v7880_v33  ;;  %v7923_v30 = vpack.c.bf16 %v397_v57, %v390_v48  ;;  %v410_v22 = vsub.f32 %v7718_v31, %v409_v36  ;;  %v291_v43 = vsub.f32 %v7726_v8, %v290_v0  ;;  %v8145_v33 = vld [vmem:[%s8889_s0 + $0x10] sm:$0xff] }
  0x3a   :  { %v404_v38 = vand.u32 4294901760, %v403_v5  ;;  %6608 = vmatpush3.bf16.msra.mxu1 %v7905_v49  ;;  %v7928_v44 = vpack.c.bf16 %v285_v17, %v278_v11  ;;  %v298_v16 = vsub.f32 %v7728_v41, %v297_v23  ;;  %v7931_v27 = vpack.c.bf16 %v409_v36, %v402_v58 }
  0x3b   :  { %9067 = vst [vmem:[#allocation49_spill] sm:$0xff] %v7917_v1  ;;  %9068 = vst [vmem:[#allocation50_spill] sm:$0xff] %v7923_v30  ;;  %v7934_v12 = vsub.f32 %v22_v4, %v7917_v1  ;;  %6610 = vmatprep.subr.bf16.mxu1 %v7923_v30  ;;  %v411_v48 = vand.u32 4294901760, %v410_v22  ;;  %v292_v57 = vand.u32 4294901760, %v291_v43  ;;  %v7937_v5 = vpack.c.bf16 %v297_v23, %v290_v0 }
  0x3c   :  { %9069 = vst [vmem:[#allocation51_spill] sm:$0xff] %v7928_v44  ;;  %9070 = vst [vmem:[#allocation52_spill] sm:$0xff] %v7931_v27  ;;  %v7939_v31 = vand.u32 4294901760, %v21_v2  ;;  %6704 = vmatpush3.bf16.msra.mxu0 %v7886_v34  ;;  %v299_v8 = vand.u32 4294901760, %v298_v16  ;;  %v416_v41 = vand.u32 4294901760, %v7735_v56  ;;  %v423_v58 = vand.u32 4294901760, %v7747_v10 }
  0x3d   :  { %9071 = vst [vmem:[#allocation53_spill] sm:$0xff] %v7937_v5  ;;  %v8923_v11 = vand.u32 4294901760, %v7934_v12  ;;  %581 = vmatprep.mubr.f32.mxu0 %v7934_v12  ;;  %6706 = vmatprep.subr.bf16.mxu0 %v7898_v19  ;;  %v7947_v4 = vpack.c.bf16 %v411_v48, %v404_v38  ;;  %v304_v0 = vand.u32 4294901760, %v7754_v40  ;;  %v311_v17 = vand.u32 4294901760, %v7756_v32 }
  0x3e   :  { %9072 = vst [vmem:[#allocation54_spill] sm:$0xff] %v7939_v31  ;;  %v7950_v36 = vsub.f32 %v21_v2, %v7939_v31  ;;  %6612 = vmatpush3.bf16.msra.mxu1 %v7928_v44  ;;  %v7955_v23 = vpack.c.bf16 %v299_v8, %v292_v57  ;;  %v417_v43 = vsub.f32 %v7735_v56, %v416_v41  ;;  %v57_v2 = vld [vmem:[%s8891_s2 + $0x100] sm:$0xff]  ;;  %v58_v56 = vld [vmem:[%s8891_s2 + $0x108] sm:$0xff]  ;;  %v9092_v19 = vand.u32 4294901760, %v7765_v62 }
  0x3f   :  { %9073 = vst [vmem:[#allocation55_spill] sm:$0xff] %v7947_v4  ;;  %v190_v22 = vsub.f32 %v7934_v12, %v8923_v11  ;;  %v424_v38 = vsub.f32 %v7747_v10, %v423_v58  ;;  %6614 = vmatprep.subr.bf16.mxu1 %v7947_v4  ;;  %v305_v48 = vsub.f32 %v7754_v40, %v304_v0  ;;  %v59_v10 = vld [vmem:[%s8891_s2 + $0x110] sm:$0xff]  ;;  %v60_v11 = vld [vmem:[%s8891_s2 + $0x118] sm:$0xff]  ;;  %v995_v49 = vand.u32 4294901760, %v57_v2 }
  0x40   :  { %9074 = vst [vmem:[#allocation56_spill] sm:$0xff] %v7955_v23  ;;  %v312_v57 = vsub.f32 %v7756_v32, %v311_v17  ;;  %584 = vmatmul.mubr.f32.gmra.mrb[2].mxu0 %v7950_v36  ;;  %v7970_v8 = vpack.c.bf16 %v423_v58, %v416_v41  ;;  %v418_v32 = vand.u32 4294901760, %v417_v43  ;;  %v7982_v45 = vpack.c.bf16 %v311_v17, %v304_v0  ;;  %v61_v41 = vld [vmem:[%s8891_s2 + $0x120] sm:$0xff]  ;;  %v62_v0 = vld [vmem:[%s8891_s2 + $0x128] sm:$0xff] }
  0x41   :  { %6708 = vmatpush3.bf16.msra.mxu0 %v7909_v53  ;;  %v191_v40 = vand.u32 4294901760, %v190_v22  ;;  %v425_v16 = vand.u32 4294901760, %v424_v38  ;;  %869 = vmatprep.mubr.f32.mxu0 %v7749_v26  ;;  %v9077_v58 = vand.u32 4294901760, %v7950_v36  ;;  %v306_v44 = vand.u32 4294901760, %v305_v48 }
  0x42   :  { %9075 = vst [vmem:[#allocation57_spill] sm:$0xff] %v7970_v8  ;;  %9076 = vst [vmem:[#allocation58_spill] sm:$0xff] %v7982_v45  ;;  %6710 = vmatprep.subr.bf16.mxu0 %v7931_v27  ;;  %v313_v30 = vand.u32 4294901760, %v312_v57  ;;  %6616 = vmatpush3.bf16.msra.mxu1 %v7955_v23  ;;  %v998_v22 = vand.u32 4294901760, %v58_v56  ;;  %v1001_v43 = vand.u32 4294901760, %v59_v10  ;;  %v1004_v38 = vand.u32 4294901760, %v60_v11 }
  0x43   :  { %v196_v4 = vsub.f32 %v7950_v36, %v9077_v58  ;;  %192 = vmatprep.mubr.f32.mxu1 %v191_v40  ;;  %v7996_v17 = vpack.c.bf16 %v425_v16, %v418_v32  ;;  %v8000_v24 = vsub.f32 %v57_v2, %v995_v49  ;;  %v1007_v48 = vand.u32 4294901760, %v61_v41  ;;  %v63_v57 = vld [vmem:[%s8891_s2 + $0x130] sm:$0xff] }
  0x44   :  { %v7998_v52 = vpack.c.bf16 %v313_v30, %v306_v44  ;;  %v8007_v40 = vpack.c.bf16 %v998_v22, %v995_v49  ;;  %v8009_v16 = vsub.f32 %v58_v56, %v998_v22  ;;  %v8011_v32 = vpack.c.bf16 %v1004_v38, %v1001_v43  ;;  %v64_v49 = vld [vmem:[%s8891_s2 + $0x138] sm:$0xff] }
  0x45   :  { %9078 = vst [vmem:[#allocation59_spill] sm:$0xff] %v7996_v17  ;;  %v197_v37 = vand.u32 4294901760, %v196_v4  ;;  %6712 = vmatpush3.bf16.msra.mxu0 %v7937_v5  ;;  %6618 = vmatprep.subr.bf16.mxu1 %v7996_v17  ;;  %v1010_v4 = vand.u32 4294901760, %v62_v0  ;;  %v8933_v30 = vand.u32 4294901760, %v8000_v24  ;;  %v8015_v44 = vsub.f32 %v59_v10, %v1001_v43  ;;  %v70_v5 = vld [vmem:[%s8891_s2 + $0x168] sm:$0xff] }
  0x46   :  { %9079 = vst [vmem:[#allocation60_spill] sm:$0xff] %v7998_v52  ;;  %9080 = vst [vmem:[#allocation61_spill] sm:$0xff] %v8011_v32  ;;  %6714 = vmatprep.subr.bf16.mxu0 %v7970_v8  ;;  %v8017_v2 = vsub.f32 %v60_v11, %v1004_v38  ;;  %v8019_v58 = vsub.f32 %v61_v41, %v1007_v48  ;;  %6620 = vmatpush3.bf16.msra.mxu1 %v7998_v52  ;;  %v1013_v10 = vand.u32 4294901760, %v63_v57 }
  0x47   :  { %198 = vmatmul.mubr.f32.gmra.mrb[2].mxu1 %v197_v37  ;;  %v8936_v37 = vand.u32 4294901760, %v8009_v16  ;;  %v8027_v56 = vpack.c.bf16 %v1010_v4, %v1007_v48  ;;  %v8029_v22 = vsub.f32 %v62_v0, %v1010_v4  ;;  %6654 = vmatprep.subr.bf16.mxu1 %v7502_v14  ;;  %v1099_v11 = vsub.f32 %v8000_v24, %v8933_v30 }
  0x48   :  { %428 = vmatprep.mubr.f32.mxu1 %v7749_v26  ;;  %v8937_v41 = vand.u32 4294901760, %v8015_v44  ;;  %v1016_v4 = vand.u32 4294901760, %v64_v49  ;;  %v8043_v52 = vsub.f32 %v63_v57, %v1013_v10  ;;  %v9082_v38 = vand.u32 4294901760, %v8017_v2  ;;  %v65_v57 = vld [vmem:[%s8891_s2 + $0x140] sm:$0xff] }
  0x49   :  { %9081 = vst [vmem:[#allocation62_spill] sm:$0xff] %v8027_v56  ;;  %6716 = vmatpush3.bf16.msra.mxu0 %v7982_v45  ;;  %v1106_v0 = vsub.f32 %v8009_v16, %v8936_v37  ;;  %v1100_v30 = vand.u32 4294901760, %v1099_v11  ;;  %v9083_v23 = vand.u32 4294901760, %v8019_v58  ;;  %v9084_v11 = vand.u32 4294901760, %v8029_v22 }
  0x4a   :  { %v1113_v43 = vsub.f32 %v8015_v44, %v8937_v41  ;;  %v1120_v17 = vsub.f32 %v8017_v2, %v9082_v38  ;;  %v8063_v59 = vpack.c.bf16 %v1016_v4, %v1013_v10  ;;  %v68_v10 = vld [vmem:[%s8891_s2 + $0x158] sm:$0xff]  ;;  %v9087_v25 = vand.u32 4294901760, %v8043_v52 }
  0x4b   :  { %430 = vmatmul.mubr.f32.vlgmr.msra.gmra.mrb[4].mxu1 %v7768_v9  ;;  %v1127_v37 = vsub.f32 %v8019_v58, %v9083_v23  ;;  %v1107_v48 = vand.u32 4294901760, %v1106_v0  ;;  %v1134_v41 = vsub.f32 %v8029_v22, %v9084_v11  ;;  %v66_v23 = vld [vmem:[%s8891_s2 + $0x148] sm:$0xff]  ;;  %v8074_v11 = vsub.f32 %v64_v49, %v1016_v4 }
  0x4c   :  { %6656 = vmatpush3.bf16.msra.mxu1 %v7510_v18  ;;  %435 = vmatprep.mubr.f32.mxu1 %v7917_v1  ;;  %9085 = vst [vmem:[#allocation63_spill] sm:$0xff] %v8063_v59  ;;  %v1114_v0 = vand.u32 4294901760, %v1113_v43  ;;  %v1121_v6 = vand.u32 4294901760, %v1120_v17  ;;  %v1141_v45 = vsub.f32 %v8043_v52, %v9087_v25  ;;  %v1019_v8 = vand.u32 4294901760, %v65_v57  ;;  %v69_v43 = vld [vmem:[%s8891_s2 + $0x160] sm:$0xff] }
  0x4d   :  { %871 = vmatmul.mubr.f32.vlgmr.msra.gmra.mrb[4].mxu0 %v7768_v9  ;;  %6658 = vmatprep.subr.bf16.mxu1 %v7514_v20  ;;  %v1128_v42 = vand.u32 4294901760, %v1127_v37  ;;  %v8079_v38 = vpack.c.bf16 %v1107_v48, %v1100_v30  ;;  %v1135_v13 = vand.u32 4294901760, %v1134_v41  ;;  %v8951_v49 = vand.u32 4294901760, %v8074_v11 }
  0x4e   :  { %876 = vmatprep.mubr.f32.mxu0 %v7917_v1  ;;  %v8089_v17 = vpack.c.bf16 %v1121_v6, %v1114_v0  ;;  %v1022_v30 = vand.u32 4294901760, %v66_v23  ;;  %v1025_v37 = vand.u32 4294901760, %v67_v54  ;;  %v1142_v41 = vand.u32 4294901760, %v1141_v45 }
  0x4f   :  { %9086 = vst [vmem:[#allocation64_spill] sm:$0xff] %v8079_v38  ;;  %437 = vmatmul.mubr.f32.gmra.mrb[6].mxu1 %v7939_v31  ;;  %6782 = vmatprep.subr.bf16.mxu0 %v8079_v38  ;;  %v8094_v25 = vpack.c.bf16 %v1135_v13, %v1128_v42  ;;  %v8096_v48 = vsub.f32 %v65_v57, %v1019_v8  ;;  %v1028_v4 = vand.u32 4294901760, %v68_v10  ;;  %v1031_v45 = vand.u32 4294901760, %v69_v43  ;;  %v71_v42 = vld [vmem:[%s8891_s2 + $0x170] sm:$0xff] }
  0x50   :  { %9088 = vst [vmem:[#allocation65_spill] sm:$0xff] %v8089_v17  ;;  %6660 = vmatpush3.bf16.msra.mxu1 %v7551_v35  ;;  %6784 = vmatpush3.bf16.msra.mxu0 %v8079_v38  ;;  %v1148_v6 = vsub.f32 %v8074_v11, %v8951_v49  ;;  %v8106_v0 = vpack.c.bf16 %v1022_v30, %v1019_v8  ;;  %v8157_v39 = vand.u32 4294901760, %v8145_v33  ;;  %v9104_v56 = vand.u32 4294901760, %v8017_v2 }
  0x51   :  { %9089 = vst [vmem:[#allocation66_spill] sm:$0xff] %v8094_v25  ;;  %6662 = vmatprep.subr.bf16.mxu1 %v7573_v47  ;;  %v8108_v13 = vsub.f32 %v66_v23, %v1022_v30  ;;  %6786 = vmatprep.subr.bf16.mxu0 %v8089_v17  ;;  %v1154_v57 = vand.u32 4294901760, %v8096_v48  ;;  %v8115_v38 = vpack.c.bf16 %v1028_v4, %v1025_v37  ;;  %v1034_v30 = vand.u32 4294901760, %v70_v5 }
  0x52   :  { %9090 = vst [vmem:[#allocation67_spill] sm:$0xff] %v8106_v0  ;;  %v8117_v27 = vsub.f32 %v67_v54, %v1025_v37  ;;  %v8119_v53 = vsub.f32 %v68_v10, %v1028_v4  ;;  %878 = vmatmul.mubr.f32.gmra.mrb[6].mxu0 %v7939_v31  ;;  %v1149_v8 = vand.u32 4294901760, %v1148_v6  ;;  %v8123_v49 = vsub.f32 %v69_v43, %v1031_v45  ;;  %v72_v37 = vld [vmem:[%s8891_s2 + $0x178] sm:$0xff] }
  0x53   :  { %9091 = vst [vmem:[#allocation68_spill] sm:$0xff] %v8115_v38  ;;  %v1161_v23 = vand.u32 4294901760, %v8108_v13  ;;  %688 = vmatprep.mubr.f32.mxu1 %v9092_v19  ;;  %v1155_v34 = vsub.f32 %v8096_v48, %v1154_v57  ;;  %v1037_v4 = vand.u32 4294901760, %v71_v42  ;;  %v8139_v19 = vpack.c.bf16 %v1034_v30, %v1031_v45  ;;  %6144 = vmatprep.mubr.f32.mxu0 %v8157_v39 }
  0x54   :  { %6664 = vmatpush3.bf16.msra.mxu1 %v7584_v51  ;;  %v1168_v54 = vand.u32 4294901760, %v8117_v27  ;;  %v1175_v10 = vand.u32 4294901760, %v8119_v53  ;;  %6788 = vmatpush3.bf16.msra.mxu0 %v8089_v17  ;;  %v8136_v43 = vpack.c.bf16 %v1149_v8, %v1142_v41  ;;  %v1182_v6 = vand.u32 4294901760, %v8123_v49 }
  0x55   :  { %6666 = vmatprep.subr.bf16.mxu1 %v7611_v63  ;;  %v1162_v62 = vsub.f32 %v8108_v13, %v1161_v23  ;;  %9094 = vst [vmem:[#allocation70_spill] sm:$0xff] %v8139_v19  ;;  %6790 = vmatprep.subr.bf16.mxu0 %v8094_v25  ;;  %v1156_v61 = vand.u32 4294901760, %v1155_v34  ;;  %v8150_v41 = vsub.f32 %v70_v5, %v1034_v30  ;;  %v1040_v28 = vand.u32 4294901760, %v72_v37  ;;  %v9096_v34 = vld [vmem:[#allocation14_spill] sm:$0xff] }
  0x56   :  { %9093 = vst [vmem:[#allocation69_spill] sm:$0xff] %v8136_v43  ;;  %v1169_v17 = vsub.f32 %v8117_v27, %v1168_v54  ;;  %v1176_v7 = vsub.f32 %v8119_v53, %v1175_v10  ;;  %v8152_v45 = vsub.f32 %v71_v42, %v1037_v4  ;;  %v1183_v5 = vsub.f32 %v8123_v49, %v1182_v6 }
  0x57   :  { %v1163_v8 = vand.u32 4294901760, %v1162_v62  ;;  %v1189_v46 = vand.u32 4294901760, %v8150_v41  ;;  %v8162_v30 = vpack.c.bf16 %v1040_v28, %v1037_v4  ;;  %v8169_v38 = vsub.f32 %v72_v37, %v1040_v28 }
  0x58   :  { %6668 = vmatpush3.bf16.msra.mxu1 %v9095_v29  ;;  %6792 = vmatpush3.bf16.msra.mxu0 %v8094_v25  ;;  %v1170_v3 = vand.u32 4294901760, %v1169_v17  ;;  %v1177_v15 = vand.u32 4294901760, %v1176_v7  ;;  %v1196_v19 = vand.u32 4294901760, %v8152_v45  ;;  %v9098_v25 = vld [vmem:[#allocation15_spill] sm:$0xff]  ;;  %v9099_v17 = vld [vmem:[#allocation18_spill] sm:$0xff]  ;;  %v1184_v4 = vand.u32 4294901760, %v1183_v5 }
  0x59   :  { %6670 = vmatprep.subr.bf16.mxu1 %v9096_v34  ;;  %9097 = vst [vmem:[#allocation11_spill] sm:$0xff] %v8162_v30  ;;  %6794 = vmatprep.subr.bf16.mxu0 %v8136_v43  ;;  %v8165_v42 = vpack.c.bf16 %v1163_v8, %v1156_v61  ;;  %v1190_v62 = vsub.f32 %v8150_v41, %v1189_v46  ;;  %v1203_v7 = vand.u32 4294901760, %v8169_v38  ;;  %v9100_v37 = vand.u32 4294901760, %v8000_v24 }
  0x5a   :  { %v8177_v61 = vpack.c.bf16 %v1177_v15, %v1170_v3  ;;  %v1197_v30 = vsub.f32 %v8152_v45, %v1196_v19  ;;  %v9101_v0 = vand.u32 4294901760, %v8009_v16  ;;  %v9106_v3 = vand.u32 4294901760, %v8019_v58 }
  0x5b   :  { %v1191_v8 = vand.u32 4294901760, %v1190_v62  ;;  %v1204_v28 = vsub.f32 %v8169_v38, %v1203_v7  ;;  %v9107_v15 = vand.u32 4294901760, %v8029_v22  ;;  %v9109_v31 = vand.u32 4294901760, %v8043_v52 }
  0x5c   :  { %6672 = vmatpush3.bf16.msra.mxu1 %v9098_v25  ;;  %6796 = vmatpush3.bf16.msra.mxu0 %v8136_v43  ;;  %v8185_v59 = vpack.c.bf16 %v9101_v0, %v9100_v37  ;;  %v9103_v43 = vand.u32 4294901760, %v8015_v44  ;;  %v9110_v32 = vand.u32 4294901760, %v8074_v11  ;;  %v9112_v0 = vld [vmem:[#allocation19_spill] sm:$0xff]  ;;  %v8206_v37 = vpack.c.bf16 %v1161_v23, %v1154_v57 }
  0x5d   :  { %6674 = vmatprep.subr.bf16.mxu1 %v9099_v17  ;;  %6798 = vmatprep.subr.bf16.mxu0 %v8165_v42  ;;  %v8197_v62 = vpack.c.bf16 %v9107_v15, %v9106_v3  ;;  %v8214_v3 = vpack.c.bf16 %v1203_v7, %v1196_v19  ;;  %v8217_v15 = vpack.c.bf16 %v1191_v8, %v1184_v4 }
  0x5e   :  { %9102 = vst [vmem:[#allocation14_spill] sm:$0xff] %v8185_v59  ;;  %v8191_v5 = vpack.c.bf16 %v9104_v56, %v9103_v43  ;;  %v8203_v1 = vpack.c.bf16 %v9110_v32, %v9109_v31  ;;  %9113 = vst [vmem:[#allocation19_spill] sm:$0xff] %v8206_v37  ;;  %v9114_v56 = vld [vmem:[#allocation22_spill] sm:$0xff]  ;;  %v8210_v43 = vpack.c.bf16 %v1175_v10, %v1168_v54  ;;  %v1198_v31 = vand.u32 4294901760, %v1197_v30 }
  0x5f   :  { %9108 = vst [vmem:[#allocation18_spill] sm:$0xff] %v8197_v62  ;;  %9117 = vst [vmem:[#allocation73_spill] sm:$0xff] %v8214_v3  ;;  %v1205_v32 = vand.u32 4294901760, %v1204_v28  ;;  %v8236_v23 = vpack.c.bf16 %v8009_v16, %v8000_v24  ;;  %v9118_v54 = vand.u32 4294901760, %v7786_v55  ;;  %v9119_v10 = vand.u32 4294901760, %v7934_v12 }
  0x60   :  { %9105 = vst [vmem:[#allocation15_spill] sm:$0xff] %v8191_v5  ;;  %9111 = vst [vmem:[#allocation71_spill] sm:$0xff] %v8203_v1  ;;  %6676 = vmatpush3.bf16.msra.mxu1 %v9112_v0  ;;  %6800 = vmatpush3.bf16.msra.mxu0 %v8165_v42  ;;  %v8212_v5 = vpack.c.bf16 %v1189_v46, %v1182_v6  ;;  %v8231_v46 = vld [vmem:[%s8889_s0 + $0x28] sm:$0xff]  ;;  %v8251_v24 = vpack.c.bf16 %v8017_v2, %v8015_v44  ;;  %v9120_v55 = vand.u32 4294901760, %v7950_v36  ;;  %v9130_v7 = vld [vmem:[#allocation11_spill] sm:$0xff] }
  0x61   :  { %6678 = vmatprep.subr.bf16.mxu1 %v9114_v56  ;;  %9115 = vst [vmem:[#allocation22_spill] sm:$0xff] %v8210_v43  ;;  %6802 = vmatprep.subr.bf16.mxu0 %v8177_v61  ;;  %v8223_v57 = vpack.c.bf16 %v1205_v32, %v1198_v31  ;;  %v8244_v19 = vand.u32 4294901760, %v8231_v46  ;;  %v1076_v12 = vsub.f32 %v8145_v33, %v8157_v39  ;;  %v9128_v6 = vld [vmem:[#allocation68_spill] sm:$0xff] }
  0x62   :  { %9116 = vst [vmem:[#allocation72_spill] sm:$0xff] %v8212_v5  ;;  %v8264_v16 = vpack.c.bf16 %v8029_v22, %v8019_v58  ;;  %v8273_v36 = vpack.c.bf16 %v8074_v11, %v8043_v52  ;;  %v8289_v52 = vpack.c.bf16 %v8119_v53, %v8117_v27  ;;  %v8297_v44 = vpack.c.bf16 %v8150_v41, %v8123_v49  ;;  %v9122_v58 = vld [vmem:[#allocation49_spill] sm:$0xff]  ;;  %v9124_v49 = vld [vmem:[#allocation54_spill] sm:$0xff] }
  0x63   :  { %v8305_v53 = vpack.c.bf16 %v8169_v38, %v8152_v45  ;;  %v1077_v27 = vand.u32 4294901760, %v1076_v12  ;;  %v1086_v22 = vsub.f32 %v8231_v46, %v8244_v19  ;;  %v9123_v38 = vld [vmem:[#allocation61_spill] sm:$0xff]  ;;  %v9129_v45 = vld [vmem:[#allocation70_spill] sm:$0xff] }
  0x64   :  { %6680 = vmatpush3.bf16.msra.mxu1 %v7724_v21  ;;  %6804 = vmatpush3.bf16.msra.mxu0 %v8177_v61 }
  0x65   :  { %6682 = vmatprep.subr.bf16.mxu1 %v7745_v50  ;;  %6806 = vmatprep.subr.bf16.mxu0 %v8217_v15  ;;  %9121 = vst [vmem:[#allocation74_spill] sm:$0xff] %v8305_v53  ;;  %v1078_v2 = vsub.f32 %v1076_v12, %v1077_v27  ;;  %v1087_v41 = vand.u32 4294901760, %v1086_v22 }
  0x67   :  { %v1079_v11 = vand.u32 4294901760, %v1078_v2  ;;  %v1088_v30 = vsub.f32 %v1086_v22, %v1087_v41  ;;  %v9131_v8 = vld [vmem:[#allocation15_spill] sm:$0xff] }
  0x68   :  { %6684 = vmatpush3.bf16.msra.mxu1 %v7752_v60  ;;  %6808 = vmatpush3.bf16.msra.mxu0 %v8217_v15 }
  0x69   :  { %6718 = vmatprep.subr.bf16.mxu1 %v7502_v14  ;;  %6810 = vmatprep.subr.bf16.mxu0 %v8223_v57  ;;  %v1089_v4 = vand.u32 4294901760, %v1088_v30 }
  0x6b   :  { %692 = vmatmul.mubr.f32.vlgmr.msra.gmra.mrb[8].mxu1 %v9118_v54 }
  0x6c   :  { %6720 = vmatpush3.bf16.msra.mxu1 %v7510_v18  ;;  %699 = vmatprep.mubr.f32.mxu1 %v9119_v10 }
  0x6d   :  { %6812 = vmatpush3.bf16.msra.mxu0 %v8223_v57  ;;  %6722 = vmatprep.subr.bf16.mxu1 %v7514_v20 }
  0x6e   :  { %6814 = vmatprep.subr.bf16.mxu0 %v8236_v23 }
  0x6f   :  { %703 = vmatmul.mubr.f32.gmra.mrb[10].mxu1 %v9120_v55 }
  0x70   :  { %6145 = vmatmul.mubr.f32.vlgmr.msra.gmra.mrb[8].mxu0 %v8244_v19  ;;  %6724 = vmatpush3.bf16.msra.mxu1 %v7551_v35 }
  0x71   :  { %6816 = vmatpush3.bf16.msra.mxu0 %v8236_v23  ;;  %6726 = vmatprep.subr.bf16.mxu1 %v7573_v47 }
  0x72   :  { %6818 = vmatprep.subr.bf16.mxu0 %v8251_v24  ;;  %980 = vmatprep.mubr.f32.mxu1 %v7749_v26  ;;  %v8281_v26 = vpack.c.bf16 %v8108_v13, %v8096_v48  ;;  %v9126_v48 = vld [vmem:[#allocation63_spill] sm:$0xff] }
  0x73   :  { %6179 = vmatprep.mubr.f32.mxu0 %v1076_v12  ;;  %v9127_v13 = vld [vmem:[#allocation67_spill] sm:$0xff] }
  0x74   :  { %6728 = vmatpush3.bf16.msra.mxu1 %v7584_v51 }
  0x75   :  { %6820 = vmatpush3.bf16.msra.mxu0 %v8251_v24  ;;  %6730 = vmatprep.subr.bf16.mxu1 %v7611_v63 }
  0x76   :  { %6822 = vmatprep.subr.bf16.mxu0 %v8264_v16 }
  0x78   :  { %6732 = vmatpush3.bf16.msra.mxu1 %v9095_v29 }
  0x79   :  { %6824 = vmatpush3.bf16.msra.mxu0 %v8264_v16  ;;  %6734 = vmatprep.subr.bf16.mxu1 %v9096_v34 }
  0x7a   :  { %6826 = vmatprep.subr.bf16.mxu0 %v8273_v36 }
  0x7c   :  { %6736 = vmatpush3.bf16.msra.mxu1 %v9098_v25 }
  0x7d   :  { %6828 = vmatpush3.bf16.msra.mxu0 %v8273_v36  ;;  %6738 = vmatprep.subr.bf16.mxu1 %v9099_v17 }
  0x7e   :  { %6830 = vmatprep.subr.bf16.mxu0 %v8281_v26 }
  0x80   :  { %6740 = vmatpush3.bf16.msra.mxu1 %v9112_v0 }
  0x81   :  { %6832 = vmatpush3.bf16.msra.mxu0 %v8281_v26  ;;  %6742 = vmatprep.subr.bf16.mxu1 %v9114_v56 }
  0x82   :  { %6834 = vmatprep.subr.bf16.mxu0 %v8289_v52 }
  0x84   :  { %6744 = vmatpush3.bf16.msra.mxu1 %v7724_v21 }
  0x85   :  { %6836 = vmatpush3.bf16.msra.mxu0 %v8289_v52  ;;  %6746 = vmatprep.subr.bf16.mxu1 %v7745_v50 }
  0x86   :  { %6838 = vmatprep.subr.bf16.mxu0 %v8297_v44 }
  0x88   :  { %6748 = vmatpush3.bf16.msra.mxu1 %v7752_v60 }
  0x89   :  { %6840 = vmatpush3.bf16.msra.mxu0 %v8297_v44  ;;  %6750 = vmatprep.subr.bf16.mxu1 %v8007_v40 }
  0x8a   :  { %6842 = vmatprep.subr.bf16.mxu0 %v8305_v53 }
  0x8b   :  { %982 = vmatmul.mubr.f32.vlgmr.msra.gmra.mrb[12].mxu1 %v7768_v9  ;;  %v9125_v9 = vld [vmem:[#allocation62_spill] sm:$0xff] }
  0x8c   :  { %6752 = vmatpush3.bf16.msra.mxu1 %v8007_v40  ;;  %987 = vmatprep.mubr.f32.mxu1 %v9122_v58 }
  0x8d   :  { %6844 = vmatpush3.bf16.msra.mxu0 %v8305_v53  ;;  %6754 = vmatprep.subr.bf16.mxu1 %v9123_v38 }
  0x8e   :  { %6846 = vmatprep.subr.bf16.mxu0 %v8007_v40 }
  0x8f   :  { %989 = vmatmul.mubr.f32.gmra.mrb[14].mxu1 %v9124_v49 }
  0x90   :  { %6180 = vmatmul.mubr.f32.vlgmr.msra.gmra.mrb[8].mxu0 %v1086_v22  ;;  %6756 = vmatpush3.bf16.msra.mxu1 %v9123_v38 }
  0x91   :  { %6848 = vmatpush3.bf16.msra.mxu0 %v8007_v40  ;;  %6758 = vmatprep.subr.bf16.mxu1 %v9125_v9 }
  0x92   :  { %6850 = vmatprep.subr.bf16.mxu0 %v9123_v38  ;;  %6109 = vmatprep.mubr.f32.mxu1 %v1079_v11 }
  0x93   :  { %6214 = vmatprep.mubr.f32.mxu0 %v1077_v27 }
  0x94   :  { %6760 = vmatpush3.bf16.msra.mxu1 %v9125_v9 }
  0x95   :  { %6852 = vmatpush3.bf16.msra.mxu0 %v9123_v38  ;;  %6762 = vmatprep.subr.bf16.mxu1 %v9126_v48 }
  0x96   :  { %6854 = vmatprep.subr.bf16.mxu0 %v9125_v9 }
  0x98   :  { %6764 = vmatpush3.bf16.msra.mxu1 %v9126_v48 }
  0x99   :  { %6856 = vmatpush3.bf16.msra.mxu0 %v9125_v9  ;;  %6766 = vmatprep.subr.bf16.mxu1 %v9127_v13 }
  0x9a   :  { %6858 = vmatprep.subr.bf16.mxu0 %v9126_v48 }
  0x9c   :  { %6768 = vmatpush3.bf16.msra.mxu1 %v9127_v13 }
  0x9d   :  { %6860 = vmatpush3.bf16.msra.mxu0 %v9126_v48  ;;  %6770 = vmatprep.subr.bf16.mxu1 %v9128_v6 }
  0x9e   :  { %6862 = vmatprep.subr.bf16.mxu0 %v9127_v13 }
  0xa0   :  { %6772 = vmatpush3.bf16.msra.mxu1 %v9128_v6 }
  0xa1   :  { %6864 = vmatpush3.bf16.msra.mxu0 %v9127_v13  ;;  %6774 = vmatprep.subr.bf16.mxu1 %v9129_v45 }
  0xa2   :  { %6866 = vmatprep.subr.bf16.mxu0 %v9128_v6 }
  0xa4   :  { %6776 = vmatpush3.bf16.msra.mxu1 %v9129_v45 }
  0xa5   :  { %6868 = vmatpush3.bf16.msra.mxu0 %v9128_v6  ;;  %6778 = vmatprep.subr.bf16.mxu1 %v9130_v7 }
  0xa6   :  { %6870 = vmatprep.subr.bf16.mxu0 %v9129_v45 }
  0xa8   :  { %6780 = vmatpush3.bf16.msra.mxu1 %v9130_v7 }
  0xa9   :  { %6872 = vmatpush3.bf16.msra.mxu0 %v9129_v45 }
  0xaa   :  { %6874 = vmatprep.subr.bf16.mxu0 %v9130_v7 }
  0xab   :  { %6110 = vmatmul.mubr.f32.vlgmr.msra.gmra.mrb[16].mxu1 %v1089_v4 }
  0xad   :  { %6876 = vmatpush3.bf16.msra.mxu0 %v9130_v7 }
  0xae   :  { %6878 = vmatprep.subr.bf16.mxu0 %v8185_v59 }
  0xb0   :  { %6215 = vmatmul.mubr.f32.vlgmr.msra.gmra.mrb[8].mxu0 %v1087_v41 }
  0xb1   :  { %6880 = vmatpush3.bf16.msra.mxu0 %v8185_v59  ;;  %6249 = vmatprep.mubr.f32.mxu0 %v8157_v39 }
  0xb2   :  { %6882 = vmatprep.subr.bf16.mxu0 %v9131_v8 }
  0xb5   :  { %6884 = vmatpush3.bf16.msra.mxu0 %v9131_v8 }
  0xb6   :  { %6886 = vmatprep.subr.bf16.mxu0 %v8197_v62 }
  0xb9   :  { %6888 = vmatpush3.bf16.msra.mxu0 %v8197_v62 }
  0xba   :  { %6890 = vmatprep.subr.bf16.mxu0 %v8203_v1 }
  0xbd   :  { %6892 = vmatpush3.bf16.msra.mxu0 %v8203_v1 }
  0xbe   :  { %6894 = vmatprep.subr.bf16.mxu0 %v8206_v37 }
  0xc1   :  { %6896 = vmatpush3.bf16.msra.mxu0 %v8206_v37 }
  0xc2   :  { %6898 = vmatprep.subr.bf16.mxu0 %v8210_v43 }
  0xc5   :  { %6900 = vmatpush3.bf16.msra.mxu0 %v8210_v43 }
  0xc6   :  { %6902 = vmatprep.subr.bf16.mxu0 %v8212_v5 }
  0xc9   :  { %6904 = vmatpush3.bf16.msra.mxu0 %v8212_v5 }
  0xca   :  { %6906 = vmatprep.subr.bf16.mxu0 %v8214_v3 }
  0xcd   :  { %6908 = vmatpush3.bf16.msra.mxu0 %v8214_v3 }
  0xce   :  { %6910 = vmatprep.subr.bf16.mxu0 %v8007_v40 }
  0xd0   :  { %6250 = vmatmul.mubr.f32.vlgmr.msra.gmra.mrb[8].mxu0 %v8244_v19 }
  0xd1   :  { %6912 = vmatpush3.bf16.msra.mxu0 %v8007_v40  ;;  %6284 = vmatprep.mubr.f32.mxu0 %v8157_v39 }
  0xd2   :  { %6914 = vmatprep.subr.bf16.mxu0 %v9123_v38 }
  0xd5   :  { %6916 = vmatpush3.bf16.msra.mxu0 %v9123_v38 }
  0xd6   :  { %6918 = vmatprep.subr.bf16.mxu0 %v9125_v9 }
  0xd9   :  { %6920 = vmatpush3.bf16.msra.mxu0 %v9125_v9 }
  0xda   :  { %6922 = vmatprep.subr.bf16.mxu0 %v9126_v48 }
  0xdd   :  { %6924 = vmatpush3.bf16.msra.mxu0 %v9126_v48 }
  0xde   :  { %6926 = vmatprep.subr.bf16.mxu0 %v9127_v13 }
  0xe1   :  { %6928 = vmatpush3.bf16.msra.mxu0 %v9127_v13 }
  0xe2   :  { %6930 = vmatprep.subr.bf16.mxu0 %v9128_v6 }
  0xe5   :  { %6932 = vmatpush3.bf16.msra.mxu0 %v9128_v6 }
  0xe6   :  { %6934 = vmatprep.subr.bf16.mxu0 %v9129_v45 }
  0xe9   :  { %6936 = vmatpush3.bf16.msra.mxu0 %v9129_v45 }
  0xea   :  { %6938 = vmatprep.subr.bf16.mxu0 %v9130_v7 }
  0xed   :  { %6940 = vmatpush3.bf16.msra.mxu0 %v9130_v7 }
  0xf0   :  { %6285 = vmatmul.mubr.f32.vlgmr.msra.gmra.mrb[8].mxu0 %v8244_v19 }
  0xfb   :  { %v5401_v39 = vpop.f32.mrb[0].mxu1 }
  0xfc   :  { %v5402_v28 = vpop.f32.mrb[1].mxu1 }
  0xfd   :  { %v5477_v31 = vpop.f32.mrb[0].mxu0  ;;  %v5403_v32 = vadd.f32 %v5402_v28, %v5401_v39 }
  0xfe   :  { %v5478_v54 = vpop.f32.mrb[1].mxu0 }
  0xff   :  { %v5479_v10 = vadd.f32 %v5478_v54, %v5477_v31 }
 0x113   :  { %v5480_v55 = vpop.f32.mrb[2].mxu0 }
 0x114   :  { %v5481_v12 = vpop.f32.mrb[3].mxu0 }
 0x115   :  { %v5482_v27 = vadd.f32 %v5481_v12, %v5480_v55 }
 0x11a   :  { %v5404_v2 = vpop.f32.mrb[2].mxu1 }
 0x11b   :  { %v5405_v58 = vpop.f32.mrb[3].mxu1 }
 0x11c   :  { %v5406_v22 = vadd.f32 %v5405_v58, %v5404_v2  ;;  %v74_v2 = vld [vmem:[%s8892_s3 + $0x8] sm:$0xff] }
 0x11e   :  { %v5439_v11 = vpop.f32.mrb[4].mxu1 }
 0x11f   :  { %v5440_v49 = vpop.f32.mrb[5].mxu1 }
 0x120   :  { %v5441_v41 = vadd.f32 %v5440_v49, %v5439_v11  ;;  %v5553_v30 = vpop.f32.mrb[4].mxu0  ;;  %v8387_v11 = vand.u32 4294901760, %v74_v2 }
 0x121   :  { %v5554_v4 = vpop.f32.mrb[5].mxu0 }
 0x122   :  { %v432_v3 = vadd.f32 %v5441_v41, %v5403_v32  ;;  %v5555_v5 = vadd.f32 %v5554_v4, %v5553_v30  ;;  %v5442_v19 = vpop.f32.mrb[6].mxu1  ;;  %v73_v32 = vld [vmem:[%s8892_s3] sm:$0xff]  ;;  %1688 = vmatprep.subr.mxu0 %v8387_v11 }
 0x123   :  { %v5443_v43 = vpop.f32.mrb[7].mxu1  ;;  %v9133_v4 = vld [vmem:[#allocation27_spill] sm:$0xff] }
 0x124   :  { %v5444_v37 = vadd.f32 %v5443_v43, %v5442_v19  ;;  %v577_v1 = vadd.f32 %v5479_v10, %v432_v3  ;;  %v8392_v43 = vand.u32 4294901760, %v73_v32  ;;  %v8395_v10 = vsub.f32 %v74_v2, %v8387_v11 }
 0x125   :  { %v5556_v39 = vpop.f32.mrb[6].mxu0 }
 0x126   :  { %v439_v28 = vadd.f32 %v5444_v37, %v5406_v22  ;;  %v5557_v31 = vpop.f32.mrb[7].mxu0  ;;  %9132 = vst [vmem:[#allocation49_spill] sm:$0xff] %v8395_v10  ;;  %v8399_v22 = vsub.f32 %v73_v32, %v8392_v43  ;;  %1690 = vmatpush1.msra.mxu0 %v8392_v43  ;;  %v8403_v30 = vand.u32 4294901760, %v8395_v10 }
 0x127   :  { %v5558_v54 = vadd.f32 %v5557_v31, %v5556_v39  ;;  %7070 = vmatprep.subr.bf16.mxu0 %v9133_v4 }
 0x128   :  { %v586_v62 = vadd.f32 %v5482_v27, %v439_v28  ;;  %v1779_v39 = vsub.f32 %v8395_v10, %v8403_v30 }
 0x13e   :  { %v5515_v55 = vpop.f32.mrb[8].mxu1 }
 0x13f   :  { %v5516_v12 = vpop.f32.mrb[9].mxu1 }
 0x140   :  { %v5517_v58 = vadd.f32 %v5516_v12, %v5515_v55  ;;  %v8413_v55 = vand.u32 4294901760, %v1779_v39 }
 0x142   :  { %v694_v3 = vadd.f32 %v5517_v58, %v577_v1  ;;  %v5518_v37 = vpop.f32.mrb[10].mxu1  ;;  %v8407_v1 = vand.u32 4294901760, %v8399_v22  ;;  %9135 = vst [vmem:[#allocation54_spill] sm:$0xff] %v8413_v55  ;;  %1781 = vmatprep.subr.mxu1 %v8413_v55 }
 0x143   :  { %v5519_v27 = vpop.f32.mrb[11].mxu1 }
 0x144   :  { %v5520_v49 = vadd.f32 %v5519_v27, %v5518_v37  ;;  %v873_v41 = vadd.f32 %v5555_v5, %v694_v3  ;;  %9134 = vst [vmem:[#allocation61_spill] sm:$0xff] %v8407_v1  ;;  %v1785_v28 = vsub.f32 %v8399_v22, %v8407_v1  ;;  %v8997_v5 = vmov 0.0  }
 0x145   :  { %1850 = vmatprep.mubr.f32.mxu1 %v8997_v5  ;;  %1753 = vmatprep.mubr.f32.mxu0 %v8997_v5 }
 0x146   :  { %v705_v19 = vadd.f32 %v5520_v49, %v586_v62  ;;  %v8415_v12 = vand.u32 4294901760, %v1785_v28 }
 0x148   :  { %v880_v31 = vadd.f32 %v5558_v54, %v705_v19  ;;  %9136 = vst [vmem:[#allocation62_spill] sm:$0xff] %v8415_v12  ;;  %1787 = vmatpush1.msra.mxu1 %v8415_v12 }
 0x149   :  { %1867 = vmatprep.subr.mxu1 %v8395_v10 }
 0x15e   :  { %v5591_v62 = vpop.f32.mrb[12].mxu1 }
 0x15f   :  { %v5592_v2 = vpop.f32.mrb[13].mxu1 }
 0x160   :  { %v5593_v58 = vadd.f32 %v5592_v2, %v5591_v62 }
 0x162   :  { %v5594_v32 = vpop.f32.mrb[14].mxu1  ;;  %v984_v54 = vadd.f32 %v5593_v58, %v873_v41 }
 0x163   :  { %v5595_v3 = vpop.f32.mrb[15].mxu1 }
 0x164   :  { %v5596_v37 = vadd.f32 %v5595_v3, %v5594_v32  ;;  %v75_v32 = vld [vmem:[%s8892_s3 + $0x10] sm:$0xff]  ;;  %v9139_v3 = vld [vmem:[#allocation31_spill] sm:$0xff] }
 0x166   :  { %v991_v27 = vadd.f32 %v5596_v37, %v880_v31  ;;  %v8462_v37 = vand.u32 4294901760, %v75_v32 }
 0x168   :  { %9140 = vst [vmem:[#allocation63_spill] sm:$0xff] %v8462_v37 }
 0x17e   :  { %v6111_v49 = vpop.f32.mrb[16].mxu1 }
 0x17f   :  { %v1092_v4 = vadd.f32 %v6111_v49, %v991_v27  ;;  %v1081_v19 = vpop.f32.mrb[17].mxu1  ;;  %v9141_v27 = vld [vmem:[#allocation32_spill] sm:$0xff]  ;;  %v9142_v49 = vld [vmem:[#allocation35_spill] sm:$0xff] }
 0x180   :  { %v1082_v39 = vadd.f32 %v1081_v19, %v984_v54  ;;  %v9138_v54 = vld [vmem:[#allocation28_spill] sm:$0xff] }
 0x181   :  { %v9144_v19 = vld [vmem:[#allocation36_spill] sm:$0xff] }
 0x1c3   :  { %v6286_v28 = vpop.f32.mrb[8].mxu0 }
 0x1c4   :  { %v7328_v12 = vadd.f32 %v6286_v28, %v1092_v4  ;;  %v1668_v8 = vpop.f32.mrb[9].mxu0  ;;  %v8471_v4 = vsub.f32 %v75_v32, %v8462_v37  ;;  %v9149_v32 = vld [vmem:[#allocation44_spill] sm:$0xff] }
 0x1c5   :  { %v7330_v59 = vadd.f32 %v1668_v8, %v1082_v39  ;;  %v9137_v8 = vmov 0.0   ;;  %v9145_v39 = vld [vmem:[#allocation38_spill] sm:$0xff] }
 0x1c6   :  { %v1679_v10 = vmul.f32 0.020833334, %v7328_v12  ;;  %9143 = vst [vmem:[#allocation67_spill] sm:$0xff] %v8471_v4  ;;  %v8478_v28 = vand.u32 4294901760, %v8471_v4 }
 0x1c7   :  { %v1678_v55 = vmul.f32 0.020833334, %v7330_v59 }
 0x1c8   :  { %v1685_v5 = vsel %vm1680_vm0, %v1679_v10, 0  ;;  %9146 = vst [vmem:[#allocation68_spill] sm:$0xff] %v8478_v28 }
 0x1c9   :  { %v8423_v53 = vand.u32 4294901760, %v1685_v5  ;;  %v1682_v41 = vsel %vm1680_vm0, %v1678_v55, 0 }
 0x1ca   :  { %v8426_v62 = vand.u32 4294901760, %v1682_v41 }
 0x1cb   :  { %v8429_v31 = vsub.f32 %v1685_v5, %v8423_v53 }
 0x1cc   :  { %v8432_v2 = vsub.f32 %v1682_v41, %v8426_v62  ;;  %1852 = vmatmul.mubr.f32.vlgmr.msra.gmra.mrb[18].mxu1 %v8426_v62  ;;  %v9147_v41 = vld [vmem:[#allocation40_spill] sm:$0xff] }
 0x1cd   :  { %1870 = vmatpush1.msra.mxu1 %v8399_v22  ;;  %1857 = vmatprep.mubr.f32.mxu1 %v9137_v8  ;;  %v8442_v10 = vand.u32 4294901760, %v8429_v31 }
 0x1ce   :  { %v8438_v59 = vand.u32 4294901760, %v8432_v2  ;;  %1951 = vmatprep.subr.mxu1 %v8387_v11 }
 0x1cf   :  { %v1768_v5 = vsub.f32 %v8429_v31, %v8442_v10 }
 0x1d0   :  { %1859 = vmatmul.mubr.f32.gmra.mrb[20].mxu1 %v8423_v53  ;;  %v1757_v55 = vsub.f32 %v8432_v2, %v8438_v59 }
 0x1d1   :  { %1933 = vmatprep.mubr.f32.mxu1 %v9137_v8  ;;  %v1769_v58 = vand.u32 4294901760, %v1768_v5  ;;  %v2291_v5 = vsub.f32 %v8471_v4, %v8478_v28 }
 0x1d2   :  { %v1758_v12 = vand.u32 4294901760, %v1757_v55  ;;  %v9148_v55 = vld [vmem:[#allocation42_spill] sm:$0xff] }
 0x1d4   :  { %1759 = vmatmul.mubr.f32.vlgmr.msra.gmra.mrb[10].mxu0 %v1758_v12  ;;  %1936 = vmatmul.mubr.f32.vlgmr.msra.gmra.mrb[18].mxu1 %v8432_v2 }
 0x1d5   :  { %1953 = vmatpush1.msra.mxu1 %v8392_v43  ;;  %1764 = vmatprep.mubr.f32.mxu0 %v9137_v8 }
 0x1d6   :  { %1941 = vmatprep.mubr.f32.mxu1 %v9137_v8  ;;  %2038 = vmatprep.subr.mxu1 %v8403_v30 }
 0x1d7   :  { %7072 = vmatpush3.bf16.msra.mxu0 %v9138_v54  ;;  %v9150_v54 = vld [vmem:[#allocation46_spill] sm:$0xff] }
 0x1d8   :  { %1770 = vmatmul.mubr.f32.gmra.mrb[12].mxu0 %v1769_v58  ;;  %1944 = vmatmul.mubr.f32.gmra.mrb[20].mxu1 %v8429_v31 }
 0x1d9   :  { %2016 = vmatprep.mubr.f32.mxu1 %v9137_v8  ;;  %7074 = vmatprep.subr.bf16.mxu0 %v9139_v3  ;;  %v8492_v3 = vand.u32 4294901760, %v2291_v5  ;;  %v8544_v5 = vld [vmem:[%s8889_s0] sm:$0xff] }
 0x1da   :  { %9158 = vst [vmem:[#allocation11_spill] sm:$0xff] %v8544_v5 }
 0x1db   :  { %7076 = vmatpush3.bf16.msra.mxu0 %v9141_v27  ;;  %9151 = vst [vmem:[#allocation70_spill] sm:$0xff] %v8492_v3  ;;  %v9152_v27 = vld [vmem:[#allocation48_spill] sm:$0xff] }
 0x1dc   :  { %2020 = vmatmul.mubr.f32.vlgmr.msra.gmra.mrb[18].mxu1 %v8438_v59  ;;  %7078 = vmatprep.subr.bf16.mxu0 %v9142_v49  ;;  %v9153_v49 = vld [vmem:[#allocation52_spill] sm:$0xff] }
 0x1dd   :  { %2042 = vmatpush1.msra.mxu1 %v8407_v1  ;;  %2025 = vmatprep.mubr.f32.mxu1 %v9137_v8  ;;  %v9189_v1 = vld [vmem:[#allocation20_spill] sm:$0xff] }
 0x1de   :  { %2121 = vmatprep.subr.mxu1 %v8387_v11 }
 0x1df   :  { %7080 = vmatpush3.bf16.msra.mxu0 %v9144_v19  ;;  %v9154_v19 = vld [vmem:[#allocation53_spill] sm:$0xff] }
 0x1e0   :  { %2029 = vmatmul.mubr.f32.gmra.mrb[20].mxu1 %v8442_v10  ;;  %7082 = vmatprep.subr.bf16.mxu0 %v9145_v39  ;;  %v9155_v39 = vld [vmem:[#allocation57_spill] sm:$0xff] }
 0x1e1   :  { %2105 = vmatprep.mubr.f32.mxu1 %v9137_v8 }
 0x1e3   :  { %7084 = vmatpush3.bf16.msra.mxu0 %v9147_v41  ;;  %v9156_v41 = vld [vmem:[#allocation58_spill] sm:$0xff] }
 0x1e4   :  { %2107 = vmatmul.mubr.f32.vlgmr.msra.gmra.mrb[18].mxu1 %v8426_v62  ;;  %7086 = vmatprep.subr.bf16.mxu0 %v9148_v55 }
 0x1e5   :  { %2123 = vmatpush1.msra.mxu1 %v8392_v43  ;;  %2112 = vmatprep.mubr.f32.mxu1 %v9137_v8 }
 0x1e6   :  { %6287 = vmatprep.subr.mxu1 %v8462_v37 }
 0x1e7   :  { %7088 = vmatpush3.bf16.msra.mxu0 %v9149_v32 }
 0x1e8   :  { %2114 = vmatmul.mubr.f32.gmra.mrb[20].mxu1 %v8423_v53  ;;  %7090 = vmatprep.subr.bf16.mxu0 %v9150_v54  ;;  %v8550_v54 = vld [vmem:[%s8889_s0 + $0x8] sm:$0xff] }
 0x1e9   :  { %2186 = vmatprep.mubr.f32.mxu1 %v9137_v8  ;;  %9159 = vst [vmem:[#allocation27_spill] sm:$0xff] %v8550_v54 }
 0x1eb   :  { %7092 = vmatpush3.bf16.msra.mxu0 %v9152_v27 }
 0x1ec   :  { %2188 = vmatmul.mubr.f32.vlgmr.msra.gmra.mrb[18].mxu1 %v8426_v62  ;;  %7094 = vmatprep.subr.bf16.mxu0 %v9153_v49 }
 0x1ed   :  { %6288 = vmatpush3.msra.mxu1 %v8462_v37  ;;  %2193 = vmatprep.mubr.f32.mxu1 %v9137_v8 }
 0x1ee   :  { %6292 = vmatprep.subr.mxu1 %v8492_v3 }
 0x1ef   :  { %7096 = vmatpush3.bf16.msra.mxu0 %v9154_v19 }
 0x1f0   :  { %2195 = vmatmul.mubr.f32.gmra.mrb[20].mxu1 %v8423_v53  ;;  %7098 = vmatprep.subr.bf16.mxu0 %v9155_v39 }
 0x1f1   :  { %6289 = vmatprep.mubr.f32.mxu1 %v1758_v12 }
 0x1f3   :  { %7100 = vmatpush3.bf16.msra.mxu0 %v9156_v41 }
 0x1f4   :  { %6290 = vmatmul.mubr.f32.vlgmr.msra.gmra.mrb[22].mxu1 %v1769_v58  ;;  %7134 = vmatprep.subr.bf16.mxu0 %v8007_v40 }
 0x1f5   :  { %6293 = vmatpush3.msra.mxu1 %v8492_v3  ;;  %6294 = vmatprep.mubr.f32.mxu1 %v8426_v62  ;;  %v9179_v3 = vld [vmem:[#allocation6_spill] sm:$0xff] }
 0x1f6   :  { %6297 = vmatprep.subr.mxu1 %v8471_v4 }
 0x1fc   :  { %6295 = vmatmul.mubr.f32.vlgmr.msra.gmra.mrb[22].mxu1 %v8423_v53 }
 0x1fd   :  { %6298 = vmatpush3.msra.mxu1 %v8471_v4  ;;  %6299 = vmatprep.mubr.f32.mxu1 %v8432_v2 }
 0x1fe   :  { %6302 = vmatprep.subr.mxu1 %v8462_v37 }
 0x204   :  { %6300 = vmatmul.mubr.f32.vlgmr.msra.gmra.mrb[22].mxu1 %v8429_v31 }
 0x205   :  { %6303 = vmatpush3.msra.mxu1 %v8462_v37  ;;  %6304 = vmatprep.mubr.f32.mxu1 %v8438_v59 }
 0x206   :  { %6307 = vmatprep.subr.mxu1 %v8478_v28 }
 0x20c   :  { %6305 = vmatmul.mubr.f32.vlgmr.msra.gmra.mrb[22].mxu1 %v8442_v10 }
 0x20d   :  { %6308 = vmatpush3.msra.mxu1 %v8478_v28  ;;  %6309 = vmatprep.mubr.f32.mxu1 %v8426_v62  ;;  %v9163_v28 = vld [vmem:[#allocation33_spill] sm:$0xff] }
 0x20e   :  { %6312 = vmatprep.subr.mxu1 %v8462_v37 }
 0x214   :  { %6310 = vmatmul.mubr.f32.vlgmr.msra.gmra.mrb[22].mxu1 %v8423_v53 }
 0x215   :  { %6313 = vmatpush3.msra.mxu1 %v8462_v37  ;;  %6314 = vmatprep.mubr.f32.mxu1 %v8426_v62  ;;  %v9185_v37 = vld [vmem:[#allocation13_spill] sm:$0xff] }
 0x216   :  { %6942 = vmatprep.subr.bf16.mxu1 %v7502_v14 }
 0x21c   :  { %6315 = vmatmul.mubr.f32.vlgmr.msra.gmra.mrb[22].mxu1 %v8423_v53  ;;  %v9157_v53 = vld [vmem:[#allocation30_spill] sm:$0xff] }
 0x21d   :  { %6944 = vmatpush3.bf16.msra.mxu1 %v7510_v18 }
 0x21e   :  { %6946 = vmatprep.subr.bf16.mxu1 %v7514_v20 }
 0x221   :  { %6948 = vmatpush3.bf16.msra.mxu1 %v7551_v35 }
 0x222   :  { %6950 = vmatprep.subr.bf16.mxu1 %v7573_v47 }
 0x225   :  { %6952 = vmatpush3.bf16.msra.mxu1 %v7584_v51 }
 0x226   :  { %6954 = vmatprep.subr.bf16.mxu1 %v7611_v63 }
 0x229   :  { %6956 = vmatpush3.bf16.msra.mxu1 %v9095_v29 }
 0x22a   :  { %6958 = vmatprep.subr.bf16.mxu1 %v9096_v34 }
 0x22d   :  { %6960 = vmatpush3.bf16.msra.mxu1 %v9098_v25 }
 0x22e   :  { %6962 = vmatprep.subr.bf16.mxu1 %v9099_v17 }
 0x231   :  { %6964 = vmatpush3.bf16.msra.mxu1 %v9112_v0 }
 0x232   :  { %6966 = vmatprep.subr.bf16.mxu1 %v9114_v56 }
 0x235   :  { %6968 = vmatpush3.bf16.msra.mxu1 %v7724_v21 }
 0x236   :  { %6970 = vmatprep.subr.bf16.mxu1 %v7745_v50 }
 0x239   :  { %6972 = vmatpush3.bf16.msra.mxu1 %v7752_v60 }
 0x23a   :  { %6974 = vmatprep.subr.bf16.mxu1 %v9157_v53 }
 0x2a7   :  { %v1760_v62 = vpop.f32.mrb[10].mxu0 }
 0x2a8   :  { %v1762_v31 = vpop.f32.mrb[11].mxu0 }
 0x2ab   :  { %v1771_v2 = vpop.f32.mrb[12].mxu0 }
 0x2ac   :  { %v1773_v59 = vpop.f32.mrb[13].mxu0 }
 0x2bf   :  { %v2189_v10 = vpop.f32.mrb[18].mxu1 }
 0x2c0   :  { %v7331_v12 = vadd.f32 %v2189_v10, %v1760_v62  ;;  %v2191_v58 = vpop.f32.mrb[19].mxu1  ;;  %v8558_v10 = vld [vmem:[%s8889_s0 + $0x18] sm:$0xff] }
 0x2c1   :  { %v7332_v55 = vadd.f32 %v2191_v58, %v1762_v31  ;;  %9160 = vst [vmem:[#allocation28_spill] sm:$0xff] %v8558_v10 }
 0x2c2   :  { %v2690_v32 = vsub.f32 %v8544_v5, %v7331_v12  ;;  %v9162_v5 = vld [vmem:[#allocation29_spill] sm:$0xff] }
 0x2c3   :  { %v2691_v27 = vsub.f32 %v8550_v54, %v7332_v55  ;;  %v2196_v49 = vpop.f32.mrb[20].mxu1  ;;  %v8566_v55 = vld [vmem:[%s8889_s0 + $0x20] sm:$0xff] }
 0x2c4   :  { %v2696_v19 = vmul.f32 %v2690_v32, %v2690_v32  ;;  %v7333_v39 = vadd.f32 %v2196_v49, %v1771_v2  ;;  %v2198_v41 = vpop.f32.mrb[21].mxu1  ;;  %9161 = vst [vmem:[#allocation31_spill] sm:$0xff] %v8566_v55 }
 0x2c5   :  { %v2697_v53 = vmul.f32 %v2691_v27, %v2691_v27  ;;  %v7334_v62 = vadd.f32 %v2198_v41, %v1773_v59 }
 0x2c6   :  { %v8553_v31 = vand.u32 4294901760, %v2696_v19  ;;  %v2693_v12 = vsub.f32 %v8558_v10, %v7333_v39 }
 0x2c7   :  { %v8561_v58 = vand.u32 4294901760, %v2697_v53  ;;  %v2694_v2 = vsub.f32 %v8566_v55, %v7334_v62 }
 0x2c8   :  { %v8570_v59 = vsub.f32 %v2696_v19, %v8553_v31  ;;  %v2699_v32 = vmul.f32 %v2693_v12, %v2693_v12 }
 0x2c9   :  { %v8573_v27 = vsub.f32 %v2697_v53, %v8561_v58  ;;  %v2700_v49 = vmul.f32 %v2694_v2, %v2694_v2  ;;  %3495 = vmatprep.mubr.f32.mxu0 %v8561_v58 }
 0x2ca   :  { %v9004_v39 = vand.u32 4294901760, %v8570_v59  ;;  %v8577_v41 = vand.u32 4294901760, %v2699_v32  ;;  %3497 = vmatmul.mubr.f32.vlgmr.msra.gmra.mrb[14].mxu0 %v8553_v31 }
 0x2cb   :  { %v8580_v10 = vand.u32 4294901760, %v2700_v49  ;;  %v9005_v62 = vand.u32 4294901760, %v8573_v27  ;;  %7136 = vmatpush3.bf16.msra.mxu0 %v8007_v40 }
 0x2cc   :  { %v8585_v19 = vsub.f32 %v2699_v32, %v8577_v41  ;;  %v2807_v53 = vsub.f32 %v8570_v59, %v9004_v39  ;;  %7138 = vmatprep.subr.bf16.mxu0 %v9123_v38 }
 0x2cd   :  { %v8592_v12 = vsub.f32 %v2700_v49, %v8580_v10  ;;  %3502 = vmatprep.mubr.f32.mxu0 %v8580_v10  ;;  %v2801_v2 = vsub.f32 %v8573_v27, %v9005_v62 }
 0x2ce   :  { %3504 = vmatmul.mubr.f32.gmra.mrb[16].mxu0 %v8577_v41  ;;  %v9009_v32 = vand.u32 4294901760, %v8585_v19  ;;  %v2808_v39 = vand.u32 4294901760, %v2807_v53 }
 0x2cf   :  { %v2802_v55 = vand.u32 4294901760, %v2801_v2  ;;  %v9010_v54 = vand.u32 4294901760, %v8592_v12  ;;  %7140 = vmatpush3.bf16.msra.mxu0 %v9123_v38 }
 0x2d0   :  { %v2822_v49 = vsub.f32 %v8585_v19, %v9009_v32  ;;  %7142 = vmatprep.subr.bf16.mxu0 %v9125_v9  ;;  %v9164_v32 = vld [vmem:[#allocation34_spill] sm:$0xff] }
 0x2d1   :  { %2803 = vmatprep.mubr.f32.mxu1 %v2802_v55  ;;  %v2816_v62 = vsub.f32 %v8592_v12, %v9010_v54  ;;  %v9165_v55 = vld [vmem:[#allocation37_spill] sm:$0xff] }
 0x2d2   :  { %2809 = vmatmul.mubr.f32.vlgmr.msra.gmra.mrb[24].mxu1 %v2808_v39  ;;  %v2823_v53 = vand.u32 4294901760, %v2822_v49  ;;  %v9167_v39 = vld [vmem:[#allocation41_spill] sm:$0xff]  ;;  %v9171_v49 = vld [vmem:[#allocation50_spill] sm:$0xff] }
 0x2d3   :  { %6976 = vmatpush3.bf16.msra.mxu1 %v9162_v5  ;;  %v2817_v2 = vand.u32 4294901760, %v2816_v62  ;;  %7144 = vmatpush3.bf16.msra.mxu0 %v9125_v9  ;;  %v9166_v5 = vld [vmem:[#allocation39_spill] sm:$0xff]  ;;  %v9169_v62 = vld [vmem:[#allocation45_spill] sm:$0xff] }
 0x2d4   :  { %6978 = vmatprep.subr.bf16.mxu1 %v9163_v28  ;;  %7146 = vmatprep.subr.bf16.mxu0 %v9126_v48  ;;  %v9168_v28 = vld [vmem:[#allocation43_spill] sm:$0xff]  ;;  %v9178_v54 = vld [vmem:[#allocation5_spill] sm:$0xff] }
 0x2d5   :  { %2818 = vmatprep.mubr.f32.mxu1 %v2817_v2  ;;  %v9172_v2 = vld [vmem:[#allocation51_spill] sm:$0xff] }
 0x2d6   :  { %2824 = vmatmul.mubr.f32.gmra.mrb[26].mxu1 %v2823_v53  ;;  %v9173_v53 = vld [vmem:[#allocation55_spill] sm:$0xff] }
 0x2d7   :  { %6980 = vmatpush3.bf16.msra.mxu1 %v9164_v32  ;;  %3054 = vmatprep.mubr.f32.mxu1 %v8561_v58  ;;  %v9170_v32 = vld [vmem:[#allocation47_spill] sm:$0xff] }
 0x2d8   :  { %6982 = vmatprep.subr.bf16.mxu1 %v9165_v55  ;;  %7148 = vmatpush3.bf16.msra.mxu0 %v9126_v48  ;;  %v9174_v55 = vld [vmem:[#allocation64_spill] sm:$0xff] }
 0x2d9   :  { %7150 = vmatprep.subr.bf16.mxu0 %v9127_v13 }
 0x2db   :  { %6984 = vmatpush3.bf16.msra.mxu1 %v9166_v5  ;;  %v9175_v5 = vld [vmem:[#allocation56_spill] sm:$0xff] }
 0x2dc   :  { %6986 = vmatprep.subr.bf16.mxu1 %v9167_v39  ;;  %7152 = vmatpush3.bf16.msra.mxu0 %v9127_v13  ;;  %v9176_v39 = vld [vmem:[#allocation59_spill] sm:$0xff] }
 0x2dd   :  { %7154 = vmatprep.subr.bf16.mxu0 %v9128_v6 }
 0x2df   :  { %6988 = vmatpush3.bf16.msra.mxu1 %v9168_v28  ;;  %v9177_v28 = vld [vmem:[#allocation60_spill] sm:$0xff] }
 0x2e0   :  { %6990 = vmatprep.subr.bf16.mxu1 %v9169_v62  ;;  %7156 = vmatpush3.bf16.msra.mxu0 %v9128_v6 }
 0x2e1   :  { %7158 = vmatprep.subr.bf16.mxu0 %v9129_v45 }
 0x2e3   :  { %6992 = vmatpush3.bf16.msra.mxu1 %v9170_v32 }
 0x2e4   :  { %6994 = vmatprep.subr.bf16.mxu1 %v9171_v49  ;;  %7160 = vmatpush3.bf16.msra.mxu0 %v9129_v45 }
 0x2e5   :  { %7162 = vmatprep.subr.bf16.mxu0 %v9130_v7 }
 0x2e7   :  { %6996 = vmatpush3.bf16.msra.mxu1 %v9172_v2 }
 0x2e8   :  { %6998 = vmatprep.subr.bf16.mxu1 %v9173_v53  ;;  %7164 = vmatpush3.bf16.msra.mxu0 %v9130_v7 }
 0x2e9   :  { %7166 = vmatprep.subr.bf16.mxu0 %v9174_v55 }
 0x2eb   :  { %7000 = vmatpush3.bf16.msra.mxu1 %v9175_v5 }
 0x2ec   :  { %7002 = vmatprep.subr.bf16.mxu1 %v9176_v39  ;;  %v9180_v39 = vld [vmem:[#allocation7_spill] sm:$0xff] }
 0x2ef   :  { %7004 = vmatpush3.bf16.msra.mxu1 %v9177_v28  ;;  %v6316_v62 = vpop.f32.mrb[22].mxu1 }
 0x2f0   :  { %v2695_v32 = vsub.f32 %v8231_v46, %v6316_v62  ;;  %v2680_v49 = vpop.f32.mrb[23].mxu1  ;;  %7006 = vmatprep.subr.bf16.mxu1 %v9178_v54  ;;  %v9181_v54 = vld [vmem:[#allocation8_spill] sm:$0xff]  ;;  %v9182_v62 = vld [vmem:[#allocation9_spill] sm:$0xff] }
 0x2f1   :  { %v2692_v2 = vsub.f32 %v8145_v33, %v2680_v49  ;;  %v9183_v49 = vld [vmem:[#allocation10_spill] sm:$0xff] }
 0x2f2   :  { %v2701_v4 = vmul.f32 %v2695_v32, %v2695_v32  ;;  %3056 = vmatmul.mubr.f32.vlgmr.msra.gmra.mrb[28].mxu1 %v8553_v31 }
 0x2f3   :  { %v2698_v53 = vmul.f32 %v2692_v2, %v2692_v2  ;;  %3061 = vmatprep.mubr.f32.mxu1 %v8580_v10  ;;  %7008 = vmatpush3.bf16.msra.mxu1 %v9179_v3 }
 0x2f4   :  { %v8643_v5 = vand.u32 4294901760, %v2701_v4  ;;  %7010 = vmatprep.subr.bf16.mxu1 %v9180_v39 }
 0x2f5   :  { %v8646_v28 = vand.u32 4294901760, %v2698_v53 }
 0x2f6   :  { %v8649_v46 = vsub.f32 %v2701_v4, %v8643_v5  ;;  %3063 = vmatmul.mubr.f32.gmra.mrb[30].mxu1 %v8577_v41 }
 0x2f7   :  { %v8653_v33 = vsub.f32 %v2698_v53, %v8646_v28  ;;  %7012 = vmatpush3.bf16.msra.mxu1 %v9181_v54  ;;  %3198 = vmatprep.mubr.f32.mxu1 %v8573_v27  ;;  %v9184_v53 = vld [vmem:[#allocation12_spill] sm:$0xff] }
 0x2f8   :  { %v9017_v3 = vand.u32 4294901760, %v8649_v46  ;;  %7014 = vmatprep.subr.bf16.mxu1 %v9182_v62  ;;  %v9186_v62 = vld [vmem:[#allocation16_spill] sm:$0xff] }
 0x2f9   :  { %v3703_v32 = vand.u32 4294901760, %v8653_v33 }
 0x2fa   :  { %v3714_v4 = vsub.f32 %v8649_v46, %v9017_v3  ;;  %v9187_v3 = vld [vmem:[#allocation65_spill] sm:$0xff] }
 0x2fb   :  { %7016 = vmatpush3.bf16.msra.mxu1 %v9183_v49  ;;  %v3704_v2 = vsub.f32 %v8653_v33, %v3703_v32  ;;  %v9188_v49 = vld [vmem:[#allocation17_spill] sm:$0xff] }
 0x2fc   :  { %7018 = vmatprep.subr.bf16.mxu1 %v9184_v53  ;;  %v3715_v54 = vand.u32 4294901760, %v3714_v4  ;;  %v9191_v4 = vld [vmem:[#allocation21_spill] sm:$0xff] }
 0x2fd   :  { %v3705_v39 = vand.u32 4294901760, %v3704_v2  ;;  %v9190_v2 = vld [vmem:[#allocation66_spill] sm:$0xff]  ;;  %v9193_v53 = vld [vmem:[#allocation69_spill] sm:$0xff] }
 0x2ff   :  { %7020 = vmatpush3.bf16.msra.mxu1 %v9185_v37  ;;  %6349 = vmatprep.mubr.f32.mxu0 %v3705_v39  ;;  %v9192_v37 = vld [vmem:[#allocation23_spill] sm:$0xff]  ;;  %v9195_v39 = vld [vmem:[#allocation25_spill] sm:$0xff] }
 0x300   :  { %6350 = vmatmul.mubr.f32.vlgmr.msra.gmra.mrb[18].mxu0 %v3715_v54  ;;  %7022 = vmatprep.subr.bf16.mxu1 %v9186_v62 }
 0x301   :  { %7168 = vmatpush3.bf16.msra.mxu0 %v9174_v55  ;;  %6384 = vmatprep.mubr.f32.mxu0 %v8646_v28  ;;  %v9194_v55 = vld [vmem:[#allocation24_spill] sm:$0xff] }
 0x302   :  { %7170 = vmatprep.subr.bf16.mxu0 %v9187_v3 }
 0x303   :  { %7024 = vmatpush3.bf16.msra.mxu1 %v9188_v49 }
 0x304   :  { %7026 = vmatprep.subr.bf16.mxu1 %v9189_v1  ;;  %v9196_v1 = vld [vmem:[#allocation26_spill] sm:$0xff] }
 0x305   :  { %7172 = vmatpush3.bf16.msra.mxu0 %v9187_v3 }
 0x306   :  { %7174 = vmatprep.subr.bf16.mxu0 %v9190_v2 }
 0x307   :  { %7028 = vmatpush3.bf16.msra.mxu1 %v9191_v4 }
 0x308   :  { %7030 = vmatprep.subr.bf16.mxu1 %v9192_v37 }
 0x309   :  { %7176 = vmatpush3.bf16.msra.mxu0 %v9190_v2 }
 0x30a   :  { %7178 = vmatprep.subr.bf16.mxu0 %v9193_v53 }
 0x30b   :  { %7032 = vmatpush3.bf16.msra.mxu1 %v9194_v55 }
 0x30c   :  { %7034 = vmatprep.subr.bf16.mxu1 %v9195_v39 }
 0x30d   :  { %7180 = vmatpush3.bf16.msra.mxu0 %v9193_v53 }
 0x30e   :  { %7182 = vmatprep.subr.bf16.mxu0 %v8165_v42 }
 0x30f   :  { %7036 = vmatpush3.bf16.msra.mxu1 %v9196_v1 }
 0x310   :  { %7038 = vmatprep.subr.bf16.mxu1 %v7502_v14 }
 0x311   :  { %7184 = vmatpush3.bf16.msra.mxu0 %v8165_v42  ;;  %v9197_v42 = vand.u32 4294901760, %v8573_v27 }
 0x312   :  { %3201 = vmatmul.mubr.f32.vlgmr.msra.gmra.mrb[32].mxu1 %v8570_v59  ;;  %7186 = vmatprep.subr.bf16.mxu0 %v8177_v61 }
 0x313   :  { %3207 = vmatprep.mubr.f32.mxu1 %v8592_v12  ;;  %7040 = vmatpush3.bf16.msra.mxu1 %v7510_v18 }
 0x314   :  { %7042 = vmatprep.subr.bf16.mxu1 %v7514_v20 }
 0x315   :  { %7188 = vmatpush3.bf16.msra.mxu0 %v8177_v61  ;;  %v9198_v61 = vand.u32 4294901760, %v8570_v59 }
 0x316   :  { %3210 = vmatmul.mubr.f32.gmra.mrb[34].mxu1 %v8585_v19  ;;  %7190 = vmatprep.subr.bf16.mxu0 %v8217_v15 }
 0x317   :  { %7044 = vmatpush3.bf16.msra.mxu1 %v7551_v35  ;;  %3314 = vmatprep.mubr.f32.mxu1 %v9197_v42 }
 0x318   :  { %7046 = vmatprep.subr.bf16.mxu1 %v7573_v47 }
 0x319   :  { %7192 = vmatpush3.bf16.msra.mxu0 %v8217_v15  ;;  %v9199_v15 = vand.u32 4294901760, %v8592_v12 }
 0x31a   :  { %7194 = vmatprep.subr.bf16.mxu0 %v8223_v57 }
 0x31b   :  { %7048 = vmatpush3.bf16.msra.mxu1 %v7584_v51 }
 0x31c   :  { %7050 = vmatprep.subr.bf16.mxu1 %v7611_v63 }
 0x31d   :  { %7196 = vmatpush3.bf16.msra.mxu0 %v8223_v57  ;;  %v9200_v57 = vand.u32 4294901760, %v8585_v19 }
 0x31e   :  { %7198 = vmatprep.subr.bf16.mxu0 %v8236_v23 }
 0x31f   :  { %7052 = vmatpush3.bf16.msra.mxu1 %v9095_v29 }
 0x320   :  { %6385 = vmatmul.mubr.f32.vlgmr.msra.gmra.mrb[18].mxu0 %v8643_v5  ;;  %7054 = vmatprep.subr.bf16.mxu1 %v9096_v34 }
 0x321   :  { %7200 = vmatpush3.bf16.msra.mxu0 %v8236_v23  ;;  %6419 = vmatprep.mubr.f32.mxu0 %v8653_v33 }
 0x322   :  { %7202 = vmatprep.subr.bf16.mxu0 %v8251_v24 }
 0x323   :  { %7056 = vmatpush3.bf16.msra.mxu1 %v9098_v25 }
 0x324   :  { %7058 = vmatprep.subr.bf16.mxu1 %v9099_v17 }
 0x325   :  { %7204 = vmatpush3.bf16.msra.mxu0 %v8251_v24 }
 0x326   :  { %7206 = vmatprep.subr.bf16.mxu0 %v8264_v16 }
 0x327   :  { %7060 = vmatpush3.bf16.msra.mxu1 %v9112_v0 }
 0x328   :  { %7062 = vmatprep.subr.bf16.mxu1 %v9114_v56 }
 0x329   :  { %7208 = vmatpush3.bf16.msra.mxu0 %v8264_v16 }
 0x32a   :  { %7210 = vmatprep.subr.bf16.mxu0 %v8273_v36 }
 0x32b   :  { %7064 = vmatpush3.bf16.msra.mxu1 %v7724_v21 }
 0x32c   :  { %7066 = vmatprep.subr.bf16.mxu1 %v7745_v50 }
 0x32d   :  { %7212 = vmatpush3.bf16.msra.mxu0 %v8273_v36 }
 0x32e   :  { %7214 = vmatprep.subr.bf16.mxu0 %v8281_v26 }
 0x32f   :  { %7068 = vmatpush3.bf16.msra.mxu1 %v7752_v60 }
 0x330   :  { %7102 = vmatprep.subr.bf16.mxu1 %v7502_v14  ;;  %v9201_v14 = vld [vmem:[#allocation74_spill] sm:$0xff] }
 0x331   :  { %7216 = vmatpush3.bf16.msra.mxu0 %v8281_v26 }
 0x332   :  { %3318 = vmatmul.mubr.f32.vlgmr.msra.gmra.mrb[36].mxu1 %v9198_v61  ;;  %7218 = vmatprep.subr.bf16.mxu0 %v8289_v52 }
 0x333   :  { %3325 = vmatprep.mubr.f32.mxu1 %v9199_v15  ;;  %7104 = vmatpush3.bf16.msra.mxu1 %v7510_v18  ;;  %v9202_v18 = vld [vmem:[#allocation54_spill] sm:$0xff] }
 0x334   :  { %7106 = vmatprep.subr.bf16.mxu1 %v7514_v20  ;;  %v9203_v20 = vld [vmem:[#allocation14_spill] sm:$0xff] }
 0x335   :  { %7220 = vmatpush3.bf16.msra.mxu0 %v8289_v52 }
 0x336   :  { %3329 = vmatmul.mubr.f32.gmra.mrb[38].mxu1 %v9200_v57  ;;  %7222 = vmatprep.subr.bf16.mxu0 %v8297_v44 }
 0x337   :  { %7108 = vmatpush3.bf16.msra.mxu1 %v7551_v35  ;;  %3606 = vmatprep.mubr.f32.mxu1 %v8561_v58  ;;  %v9204_v35 = vand.u32 4294901760, %v8649_v46 }
 0x338   :  { %7110 = vmatprep.subr.bf16.mxu1 %v7573_v47  ;;  %v9205_v47 = vld [vmem:[#allocation15_spill] sm:$0xff] }
 0x339   :  { %7224 = vmatpush3.bf16.msra.mxu0 %v8297_v44 }
 0x33a   :  { %7226 = vmatprep.subr.bf16.mxu0 %v9201_v14 }
 0x33b   :  { %7112 = vmatpush3.bf16.msra.mxu1 %v7584_v51  ;;  %v9206_v51 = vld [vmem:[#allocation18_spill] sm:$0xff] }
 0x33c   :  { %7114 = vmatprep.subr.bf16.mxu1 %v7611_v63  ;;  %v9207_v63 = vld [vmem:[#allocation71_spill] sm:$0xff] }
 0x33d   :  { %7228 = vmatpush3.bf16.msra.mxu0 %v9201_v14 }
 0x33e   :  { %7230 = vmatprep.subr.bf16.mxu0 %v8007_v40 }
 0x33f   :  { %7116 = vmatpush3.bf16.msra.mxu1 %v9095_v29  ;;  %v9211_v29 = vld [vmem:[#allocation73_spill] sm:$0xff] }
 0x340   :  { %6420 = vmatmul.mubr.f32.vlgmr.msra.gmra.mrb[18].mxu0 %v8649_v46  ;;  %7118 = vmatprep.subr.bf16.mxu1 %v9096_v34 }
 0x341   :  { %7232 = vmatpush3.bf16.msra.mxu0 %v8007_v40  ;;  %6454 = vmatprep.mubr.f32.mxu0 %v3703_v32 }
 0x342   :  { %7234 = vmatprep.subr.bf16.mxu0 %v9123_v38 }
 0x343   :  { %7120 = vmatpush3.bf16.msra.mxu1 %v9098_v25 }
 0x344   :  { %7122 = vmatprep.subr.bf16.mxu1 %v9099_v17 }
 0x345   :  { %7236 = vmatpush3.bf16.msra.mxu0 %v9123_v38 }
 0x346   :  { %7238 = vmatprep.subr.bf16.mxu0 %v9125_v9 }
 0x347   :  { %7124 = vmatpush3.bf16.msra.mxu1 %v9112_v0 }
 0x348   :  { %7126 = vmatprep.subr.bf16.mxu1 %v9114_v56 }
 0x349   :  { %7240 = vmatpush3.bf16.msra.mxu0 %v9125_v9 }
 0x34a   :  { %7242 = vmatprep.subr.bf16.mxu0 %v9126_v48 }
 0x34b   :  { %7128 = vmatpush3.bf16.msra.mxu1 %v7724_v21  ;;  %v9208_v21 = vld [vmem:[#allocation19_spill] sm:$0xff] }
 0x34c   :  { %7130 = vmatprep.subr.bf16.mxu1 %v7745_v50  ;;  %v9209_v50 = vld [vmem:[#allocation22_spill] sm:$0xff] }
 0x34d   :  { %7244 = vmatpush3.bf16.msra.mxu0 %v9126_v48 }
 0x34e   :  { %7246 = vmatprep.subr.bf16.mxu0 %v9127_v13 }
 0x34f   :  { %7132 = vmatpush3.bf16.msra.mxu1 %v7752_v60  ;;  %v9210_v60 = vld [vmem:[#allocation72_spill] sm:$0xff] }
 0x350   :  { %7325 = vmatprep.subr.mxu1 %v8387_v11 }
 0x351   :  { %7248 = vmatpush3.bf16.msra.mxu0 %v9127_v13 }
 0x352   :  { %3608 = vmatmul.mubr.f32.vlgmr.msra.gmra.mrb[40].mxu1 %v8553_v31  ;;  %7250 = vmatprep.subr.bf16.mxu0 %v9128_v6 }
 0x353   :  { %3613 = vmatprep.mubr.f32.mxu1 %v8580_v10  ;;  %7326 = vmatpush1.msra.mxu1 %v8392_v43 }
 0x354   :  { %4410 = vmatprep.subr.mxu1 %v9202_v18 }
 0x355   :  { %7252 = vmatpush3.bf16.msra.mxu0 %v9128_v6 }
 0x356   :  { %3615 = vmatmul.mubr.f32.gmra.mrb[42].mxu1 %v8577_v41  ;;  %7254 = vmatprep.subr.bf16.mxu0 %v9129_v45 }
 0x357   :  { %4393 = vmatprep.mubr.f32.mxu1 %v9137_v8 }
 0x359   :  { %7256 = vmatpush3.bf16.msra.mxu0 %v9129_v45 }
 0x35a   :  { %7258 = vmatprep.subr.bf16.mxu0 %v9130_v7 }
 0x35d   :  { %7260 = vmatpush3.bf16.msra.mxu0 %v9130_v7 }
 0x35e   :  { %7262 = vmatprep.subr.bf16.mxu0 %v9203_v20 }
 0x360   :  { %6455 = vmatmul.mubr.f32.vlgmr.msra.gmra.mrb[18].mxu0 %v9204_v35 }
 0x361   :  { %7264 = vmatpush3.bf16.msra.mxu0 %v9203_v20  ;;  %6489 = vmatprep.mubr.f32.mxu0 %v8646_v28 }
 0x362   :  { %7266 = vmatprep.subr.bf16.mxu0 %v9205_v47 }
 0x365   :  { %7268 = vmatpush3.bf16.msra.mxu0 %v9205_v47 }
 0x366   :  { %7270 = vmatprep.subr.bf16.mxu0 %v9206_v51 }
 0x369   :  { %7272 = vmatpush3.bf16.msra.mxu0 %v9206_v51 }
 0x36a   :  { %7274 = vmatprep.subr.bf16.mxu0 %v9207_v63 }
 0x36d   :  { %7276 = vmatpush3.bf16.msra.mxu0 %v9207_v63 }
 0x36e   :  { %7278 = vmatprep.subr.bf16.mxu0 %v9208_v21 }
 0x371   :  { %7280 = vmatpush3.bf16.msra.mxu0 %v9208_v21 }
 0x372   :  { %7282 = vmatprep.subr.bf16.mxu0 %v9209_v50 }
 0x375   :  { %7284 = vmatpush3.bf16.msra.mxu0 %v9209_v50 }
 0x376   :  { %7286 = vmatprep.subr.bf16.mxu0 %v9210_v60 }
 0x379   :  { %7288 = vmatpush3.bf16.msra.mxu0 %v9210_v60 }
 0x37a   :  { %7290 = vmatprep.subr.bf16.mxu0 %v9211_v29 }
 0x37d   :  { %7292 = vmatpush3.bf16.msra.mxu0 %v9211_v29 }
 0x37e   :  { %7294 = vmatprep.subr.bf16.mxu0 %v8007_v40 }
 0x380   :  { %6490 = vmatmul.mubr.f32.vlgmr.msra.gmra.mrb[18].mxu0 %v8643_v5 }
 0x381   :  { %7296 = vmatpush3.bf16.msra.mxu0 %v8007_v40  ;;  %6524 = vmatprep.mubr.f32.mxu0 %v8646_v28 }
 0x382   :  { %7298 = vmatprep.subr.bf16.mxu0 %v9123_v38 }
 0x385   :  { %7300 = vmatpush3.bf16.msra.mxu0 %v9123_v38 }
 0x386   :  { %7302 = vmatprep.subr.bf16.mxu0 %v9125_v9 }
 0x389   :  { %7304 = vmatpush3.bf16.msra.mxu0 %v9125_v9 }
 0x38a   :  { %7306 = vmatprep.subr.bf16.mxu0 %v9126_v48 }
 0x38d   :  { %7308 = vmatpush3.bf16.msra.mxu0 %v9126_v48 }
 0x38e   :  { %7310 = vmatprep.subr.bf16.mxu0 %v9127_v13 }
 0x391   :  { %7312 = vmatpush3.bf16.msra.mxu0 %v9127_v13 }
 0x392   :  { %7314 = vmatprep.subr.bf16.mxu0 %v9128_v6 }
 0x395   :  { %7316 = vmatpush3.bf16.msra.mxu0 %v9128_v6 }
 0x396   :  { %7318 = vmatprep.subr.bf16.mxu0 %v9129_v45 }
 0x399   :  { %7320 = vmatpush3.bf16.msra.mxu0 %v9129_v45 }
 0x39a   :  { %7322 = vmatprep.subr.bf16.mxu0 %v9130_v7 }
 0x39d   :  { %7324 = vmatpush3.bf16.msra.mxu0 %v9130_v7  ;;  %v5907_v40 = vpop.f32.mrb[14].mxu0 }
 0x39e   :  { %v5908_v25 = vpop.f32.mrb[15].mxu0  ;;  %4317 = vmatprep.subr.mxu0 %v8387_v11 }
 0x39f   :  { %v5909_v34 = vadd.f32 %v5908_v25, %v5907_v40 }
 0x3a0   :  { %6525 = vmatmul.mubr.f32.vlgmr.msra.gmra.mrb[18].mxu0 %v8643_v5 }
 0x3a1   :  { %v5910_v17 = vpop.f32.mrb[16].mxu0  ;;  %4319 = vmatpush1.msra.mxu0 %v8392_v43  ;;  %4382 = vmatprep.mubr.f32.mxu0 %v9137_v8 }
 0x3a2   :  { %v5911_v0 = vpop.f32.mrb[17].mxu0 }
 0x3a3   :  { %v5912_v56 = vadd.f32 %v5911_v0, %v5910_v17 }
 0x3a5   :  { %v5755_v23 = vpop.f32.mrb[24].mxu1 }
 0x3a6   :  { %v5756_v24 = vpop.f32.mrb[25].mxu1 }
 0x3a7   :  { %v5757_v16 = vadd.f32 %v5756_v24, %v5755_v23 }
 0x3a9   :  { %v5758_v36 = vpop.f32.mrb[26].mxu1 }
 0x3aa   :  { %v5759_v26 = vpop.f32.mrb[27].mxu1 }
 0x3ab   :  { %v5760_v52 = vadd.f32 %v5759_v26, %v5758_v36  ;;  %v9212_v36 = vld [vmem:[#allocation62_spill] sm:$0xff]  ;;  %v9213_v26 = vld [vmem:[#allocation49_spill] sm:$0xff] }
 0x3c5   :  { %v5793_v44 = vpop.f32.mrb[28].mxu1 }
 0x3c6   :  { %v5794_v38 = vpop.f32.mrb[29].mxu1 }
 0x3c7   :  { %v5795_v9 = vadd.f32 %v5794_v38, %v5793_v44  ;;  %v5326_v38 = vlaneseq }
 0x3c9   :  { %v3058_v48 = vadd.f32 %v5795_v9, %v5757_v16  ;;  %v5796_v13 = vpop.f32.mrb[30].mxu1  ;;  %v5327_v9 = vshrl.u32 %v5326_v38, 7 }
 0x3ca   :  { %v5797_v6 = vpop.f32.mrb[31].mxu1 }
 0x3cb   :  { %v5798_v45 = vadd.f32 %v5797_v6, %v5796_v13  ;;  %v24_v13 = vld [vmem:[%s8890_s1] sm:$0x7]  ;;  %v5332_v6 = vsub.s32 1, %v5327_v9  ;;  %s7450_s1 = smov [#allocation2]  }
 0x3cc   :  { %s5358_s7 = sshll.u32 %s7450_s1, 4  ;;  %s5359_s7 = int_to_ptr.vmem [resolvable:$true] %s5358_s7 }
 0x3cd   :  { %v3065_v7 = vadd.f32 %v5798_v45, %v5760_v52  ;;  %v9215_v52 = vld [vmem:[#allocation63_spill] sm:$0xff]  ;;  %s7425_s12 = scalar_lea.vmem %s5359_s7, 768  ;;  %p7430_p1 = scmp.lt.s32.totalorder %s5359_s7, %s5359_s7 }
 0x3ce   :  { %p7426_p0 = scmp.ne.s32.totalorder %s5359_s7, %s7425_s12  ;;  %p7431_p2 = scmp.lt.s32.totalorder %s7425_s12, %s7425_s12 }
 0x3d0   :  { %p7432_p3 = por %p7431_p2, %p7430_p1 }
 0x3d2   :  { %p7433_p4 = pnand %p7432_p3, %p7426_p0 }
 0x3e5   :  { %v5831_v31 = vpop.f32.mrb[32].mxu1 }
 0x3e6   :  { %v5832_v10 = vpop.f32.mrb[33].mxu1 }
 0x3e7   :  { %v5833_v58 = vadd.f32 %v5832_v10, %v5831_v31 }
 0x3e9   :  { %v3203_v59 = vadd.f32 %v5833_v58, %v3058_v48  ;;  %v5834_v27 = vpop.f32.mrb[34].mxu1  ;;  %v5328_v48 = vsub.s32 0, %v5327_v9 }
 0x3ea   :  { %v5835_v41 = vpop.f32.mrb[35].mxu1 }
 0x3eb   :  { %v5836_v19 = vadd.f32 %v5835_v41, %v5834_v27  ;;  %v5329_v31 = vrot.slane %v24_v13, %v5328_v48  ;;  %v9219_v27 = vld [vmem:[#allocation11_spill] sm:$0xff] }
 0x3ed   :  { %v3212_v12 = vadd.f32 %v5836_v19, %v3065_v7  ;;  %v9220_v19 = vld [vmem:[#allocation27_spill] sm:$0xff] }
 0x405   :  { %v5869_v5 = vpop.f32.mrb[36].mxu1 }
 0x406   :  { %v5870_v28 = vpop.f32.mrb[37].mxu1 }
 0x407   :  { %v5871_v46 = vadd.f32 %v5870_v28, %v5869_v5 }
 0x409   :  { %v3320_v33 = vadd.f32 %v5871_v46, %v3203_v59  ;;  %v5872_v3 = vpop.f32.mrb[38].mxu1  ;;  %v5333_v59 = vrot.slane %v24_v13, %v5332_v6  ;;  %v9221_v46 = vld [vmem:[#allocation28_spill] sm:$0xff] }
 0x40a   :  { %v5873_v32 = vpop.f32.mrb[39].mxu1 }
 0x40b   :  { %v5874_v54 = vadd.f32 %v5873_v32, %v5872_v3  ;;  %v3499_v62 = vadd.f32 %v5909_v34, %v3320_v33 }
 0x40d   :  { %v3331_v49 = vadd.f32 %v5874_v54, %v3212_v12  ;;  %v9222_v54 = vld [vmem:[#allocation31_spill] sm:$0xff] }
 0x40f   :  { %v3506_v2 = vadd.f32 %v5912_v56, %v3331_v49 }
 0x425   :  { %v5945_v4 = vpop.f32.mrb[40].mxu1 }
 0x426   :  { %v5946_v37 = vpop.f32.mrb[41].mxu1 }
 0x427   :  { %v5947_v53 = vadd.f32 %v5946_v37, %v5945_v4  ;;  %v5336_v4 = vsub.s32 2, %v5327_v9 }
 0x429   :  { %v5948_v55 = vpop.f32.mrb[42].mxu1  ;;  %v3610_v39 = vadd.f32 %v5947_v53, %v3499_v62  ;;  %v5337_v37 = vrot.slane %v24_v13, %v5336_v4 }
 0x42a   :  { %v5949_v1 = vpop.f32.mrb[43].mxu1 }
 0x42b   :  { %v5950_v42 = vadd.f32 %v5949_v1, %v5948_v55  ;;  %v7423_v55 = vld [vmem:[%s8889_s0 + $0x28] sm:$0xff] }
 0x42d   :  { %v3617_v61 = vadd.f32 %v5950_v42, %v3506_v2  ;;  %v7424_v42 = vld [vmem:[%s8889_s0 + $0x10] sm:$0xff] }
 0x473   :  { %v6526_v15 = vpop.f32.mrb[18].mxu0 }
 0x474   :  { %v7335_v57 = vadd.f32 %v6526_v15, %v3617_v61  ;;  %v4294_v14 = vpop.f32.mrb[19].mxu0 }
 0x475   :  { %v7336_v18 = vadd.f32 %v4294_v14, %v3610_v39 }
 0x476   :  { %v4305_v20 = vmul.f32 0.020833334, %v7335_v57 }
 0x477   :  { %v4304_v35 = vmul.f32 0.020833334, %v7336_v18 }
 0x478   :  { %v4307_v47 = vadd.f32 1e-05, %v4305_v20 }
 0x479   :  { %v4306_v51 = vadd.f32 1e-05, %v4304_v35 }
 0x47a   :  { %7415 = vrsqrt.f32 %v4307_v47 }
 0x47b   :  { %7417 = vrsqrt.f32 %v4306_v51 }
 0x484   :  { %v7416_v63 = vpop.eup %7415 }
 0x485   :  { %v7418_v21 = vpop.eup %7417  ;;  %v4314_v50 = vsel %vm1680_vm0, %v7416_v63, 0 }
 0x486   :  { %v8823_v60 = vand.u32 4294901760, %v4314_v50  ;;  %v4311_v29 = vsel %vm1680_vm0, %v7418_v21, 0 }
 0x487   :  { %v4383_v40 = vand.u32 4294901760, %v4311_v29 }
 0x488   :  { %v4395_v25 = vsub.f32 %v4314_v50, %v8823_v60 }
 0x489   :  { %v4384_v34 = vsub.f32 %v4311_v29, %v4383_v40 }
 0x48a   :  { %v4396_v17 = vand.u32 4294901760, %v4395_v25 }
 0x48b   :  { %v4385_v0 = vand.u32 4294901760, %v4384_v34 }
 0x48c   :  { %v4397_v56 = vsub.f32 %v4395_v25, %v4396_v17 }
 0x48d   :  { %v4386_v23 = vsub.f32 %v4384_v34, %v4385_v0 }
 0x48e   :  { %v4398_v24 = vand.u32 4294901760, %v4397_v56 }
 0x48f   :  { %v4387_v16 = vand.u32 4294901760, %v4386_v23 }
 0x490   :  { %4399 = vmatmul.mubr.f32.vlgmr.msra.gmra.mrb[44].mxu1 %v4398_v24 }
 0x491   :  { %4416 = vmatpush1.msra.mxu1 %v9212_v36  ;;  %4388 = vmatmul.mubr.f32.vlgmr.msra.gmra.mrb[20].mxu0 %v4387_v16 }
 0x492   :  { %4479 = vmatprep.mubr.f32.mxu1 %v9137_v8  ;;  %4496 = vmatprep.subr.mxu1 %v9213_v26 }
 0x494   :  { %4481 = vmatmul.mubr.f32.vlgmr.msra.gmra.mrb[46].mxu1 %v4383_v40 }
 0x495   :  { %4499 = vmatpush1.msra.mxu1 %v8399_v22  ;;  %4486 = vmatprep.mubr.f32.mxu1 %v9137_v8  ;;  %v9214_v22 = vld [vmem:[#allocation61_spill] sm:$0xff] }
 0x496   :  { %4580 = vmatprep.subr.mxu1 %v8387_v11 }
 0x498   :  { %4488 = vmatmul.mubr.f32.gmra.mrb[44].mxu1 %v8823_v60 }
 0x499   :  { %4562 = vmatprep.mubr.f32.mxu1 %v9137_v8 }
 0x49c   :  { %4565 = vmatmul.mubr.f32.vlgmr.msra.gmra.mrb[46].mxu1 %v4384_v34 }
 0x49d   :  { %4582 = vmatpush1.msra.mxu1 %v8392_v43  ;;  %4570 = vmatprep.mubr.f32.mxu1 %v9137_v8 }
 0x49e   :  { %4667 = vmatprep.subr.mxu1 %v8403_v30  ;;  %v9218_v30 = vld [vmem:[#allocation68_spill] sm:$0xff] }
 0x4a0   :  { %4573 = vmatmul.mubr.f32.gmra.mrb[44].mxu1 %v4395_v25 }
 0x4a1   :  { %4645 = vmatprep.mubr.f32.mxu1 %v9137_v8 }
 0x4a4   :  { %4649 = vmatmul.mubr.f32.vlgmr.msra.gmra.mrb[46].mxu1 %v4385_v0 }
 0x4a5   :  { %4671 = vmatpush1.msra.mxu1 %v9214_v22  ;;  %4654 = vmatprep.mubr.f32.mxu1 %v9137_v8 }
 0x4a6   :  { %4750 = vmatprep.subr.mxu1 %v8387_v11  ;;  %v9216_v11 = vld [vmem:[#allocation70_spill] sm:$0xff] }
 0x4a8   :  { %4658 = vmatmul.mubr.f32.gmra.mrb[44].mxu1 %v4396_v17 }
 0x4a9   :  { %4734 = vmatprep.mubr.f32.mxu1 %v9137_v8 }
 0x4ac   :  { %4736 = vmatmul.mubr.f32.vlgmr.msra.gmra.mrb[46].mxu1 %v4383_v40 }
 0x4ad   :  { %4752 = vmatpush1.msra.mxu1 %v8392_v43  ;;  %4741 = vmatprep.mubr.f32.mxu1 %v9137_v8  ;;  %v9217_v43 = vld [vmem:[#allocation67_spill] sm:$0xff] }
 0x4ae   :  { %6527 = vmatprep.subr.mxu1 %v9215_v52 }
 0x4b0   :  { %4743 = vmatmul.mubr.f32.gmra.mrb[44].mxu1 %v8823_v60 }
 0x4b1   :  { %4815 = vmatprep.mubr.f32.mxu1 %v9137_v8 }
 0x4b4   :  { %4817 = vmatmul.mubr.f32.vlgmr.msra.gmra.mrb[46].mxu1 %v4383_v40 }
 0x4b5   :  { %6528 = vmatpush3.msra.mxu1 %v9215_v52  ;;  %4822 = vmatprep.mubr.f32.mxu1 %v9137_v8 }
 0x4b6   :  { %6532 = vmatprep.subr.mxu1 %v9216_v11 }
 0x4b8   :  { %4824 = vmatmul.mubr.f32.gmra.mrb[44].mxu1 %v8823_v60 }
 0x4b9   :  { %6529 = vmatprep.mubr.f32.mxu1 %v4387_v16 }
 0x4bc   :  { %6530 = vmatmul.mubr.f32.vlgmr.msra.gmra.mrb[48].mxu1 %v4398_v24 }
 0x4bd   :  { %6533 = vmatpush3.msra.mxu1 %v9216_v11  ;;  %6534 = vmatprep.mubr.f32.mxu1 %v4383_v40 }
 0x4be   :  { %6537 = vmatprep.subr.mxu1 %v9217_v43 }
 0x4c4   :  { %6535 = vmatmul.mubr.f32.vlgmr.msra.gmra.mrb[48].mxu1 %v8823_v60 }
 0x4c5   :  { %6538 = vmatpush3.msra.mxu1 %v9217_v43  ;;  %6539 = vmatprep.mubr.f32.mxu1 %v4384_v34 }
 0x4c6   :  { %6542 = vmatprep.subr.mxu1 %v9215_v52 }
 0x4cc   :  { %6540 = vmatmul.mubr.f32.vlgmr.msra.gmra.mrb[48].mxu1 %v4395_v25 }
 0x4cd   :  { %6543 = vmatpush3.msra.mxu1 %v9215_v52  ;;  %6544 = vmatprep.mubr.f32.mxu1 %v4385_v0 }
 0x4ce   :  { %6547 = vmatprep.subr.mxu1 %v9218_v30 }
 0x4d4   :  { %6545 = vmatmul.mubr.f32.vlgmr.msra.gmra.mrb[48].mxu1 %v4396_v17 }
 0x4d5   :  { %6548 = vmatpush3.msra.mxu1 %v9218_v30  ;;  %6549 = vmatprep.mubr.f32.mxu1 %v4383_v40 }
 0x4d6   :  { %6552 = vmatprep.subr.mxu1 %v9215_v52 }
 0x4dc   :  { %6550 = vmatmul.mubr.f32.vlgmr.msra.gmra.mrb[48].mxu1 %v8823_v60 }
 0x4dd   :  { %6553 = vmatpush3.msra.mxu1 %v9215_v52  ;;  %6554 = vmatprep.mubr.f32.mxu1 %v4383_v40 }
 0x4e4   :  { %6555 = vmatmul.mubr.f32.vlgmr.msra.gmra.mrb[48].mxu1 %v8823_v60 }
 0x564   :  { %v4389_v8 = vpop.f32.mrb[20].mxu0 }
 0x565   :  { %v4391_v44 = vpop.f32.mrb[21].mxu0 }
 0x587   :  { %v4818_v45 = vpop.f32.mrb[46].mxu1 }
 0x588   :  { %v7337_v7 = vadd.f32 %v4818_v45, %v4389_v8  ;;  %v4820_v10 = vpop.f32.mrb[47].mxu1 }
 0x589   :  { %v7338_v58 = vadd.f32 %v4820_v10, %v4391_v44 }
 0x58a   :  { %v5319_v41 = vmul.f32 %v9219_v27, %v7337_v7 }
 0x58b   :  { %v5320_v12 = vmul.f32 %v9220_v19, %v7338_v58  ;;  %v4825_v5 = vpop.f32.mrb[44].mxu1 }
 0x58c   :  { %v5341_v28 = vmul.f32 %v5329_v31, %v5319_v41  ;;  %v5322_v33 = vmul.f32 %v9221_v46, %v4825_v5  ;;  %v4827_v3 = vpop.f32.mrb[45].mxu1 }
 0x58d   :  { %v5342_v32 = vmul.f32 %v5333_v59, %v5320_v12  ;;  %v5323_v62 = vmul.f32 %v9222_v54, %v4827_v3 }
 0x58e   :  { %5347 = vst [vmem:[#allocation2] sm:$0xff] %v5341_v28  ;;  %v5344_v49 = vmul.f32 %v5329_v31, %v5322_v33 }
 0x58f   :  { %5348 = vst [vmem:[#allocation2 + $0x8] sm:$0xff] %v5342_v32  ;;  %v5345_v2 = vmul.f32 %v5333_v59, %v5323_v62 }
 0x590   :  { %5350 = vst [vmem:[#allocation2 + $0x18] sm:$0xff] %v5344_v49 }
 0x591   :  { %5351 = vst [vmem:[#allocation2 + $0x20] sm:$0xff] %v5345_v2 }
 0x5b7   :  { %v6556_v53 = vpop.f32.mrb[48].mxu1 }
 0x5b8   :  { %v5324_v39 = vmul.f32 %v7423_v55, %v6556_v53  ;;  %v5309_v1 = vpop.f32.mrb[49].mxu1 }
 0x5b9   :  { %v5321_v61 = vmul.f32 %v7424_v42, %v5309_v1 }
 0x5ba   :  { %v5346_v15 = vmul.f32 %v5337_v37, %v5324_v39 }
 0x5bb   :  { %v5343_v57 = vmul.f32 %v5337_v37, %v5321_v61 }
 0x5bc   :  { %5352 = vst [vmem:[#allocation2 + $0x28] sm:$0xff] %v5346_v15 }
 0x5bd   :  { %5349 = vst [vmem:[#allocation2 + $0x10] sm:$0xff] %v5343_v57 }
 0x5be   :  { %7436 = shalt.err (!%p7433_p4)
}
 0x5bf   :  { %s7437_s15 = scalar_lea.hbm %s8893_s4, 768 }
 0x5c0   :  { %p7438_p5 = scmp.ne.s32.totalorder %s8893_s4, %s7437_s15  ;;  %p7441_p6 = scmp.lt.u32.totalorder %s7437_s15, %s8893_s4 }
 0x5c2   :  { %p7443_p7 = pnand %p7441_p6, %p7438_p5 }
 0x5c4   :  { %7446 = shalt.err (!%p7443_p7)
}
 0x5c5   :  { %s7451_s18 = smov 384   ;;  %s7452_s19 = smov 24  }
 0x5c6   :  { %5364 = dma.vmem_to_hbm [thread:$0]  %s5359_s7, 768, %s8893_s4, [#allocation3], %s7451_s18, %s7451_s18, %s7452_s19  }
 0x5c7   :  { %7447 = dma.done.wait [#allocation3], 768  }
 0x5c8   :  { %7448 = vsyncadd [#allocation3], 4294966528 }
 0x5c9   :  { %5368 = vsyncpa [#allocation3], 1 }

</bundles_post_ra>
